<compile_context>
chip_gen: v7x
topology: tpu7x:2x2x1
jax: 0.10.0
libtpu: 0.0.40
codegen_flags: <defaults>
</compile_context>

<pallas_src>
import functools

import jax
import jax.numpy as jnp
from jax.experimental import pallas as pl
from jax.experimental.pallas import tpu as pltpu

EPS = 1e-5
_NEG_INF = -1e30


def _round_up(x, m):
    return (x + m - 1) // m * m


def _full_spec(shape):
    nd = len(shape)
    return pl.BlockSpec(shape, lambda i, nv: (0,) * nd)


# ---------------------------------------------------------------------------
# Fused kernel: tiled gated-attention pooling (online softmax) + multimodal head
# ---------------------------------------------------------------------------
def _fused_clam_head_kernel(
        nv_ref,                                                  # scalar prefetch (SMEM)
        h_ref, wfc_ref, bfc_ref, wab_ref, bab_ref, wc_ref, bc_ref,
        meta_ref, w1_ref, b1_ref, w2_ref, b2_ref,
        wf1_ref, bf1_ref, wf2_ref, bf2_ref, wcls_ref, bcls_ref,  # inputs
        logits_ref, probs_ref, a_raw_ref,                        # outputs
        m_sc, l_sc, acc_sc):                                     # VMEM scratch
    i = pl.program_id(0)
    tile_n = h_ref.shape[0]
    attn_dim = wab_ref.shape[1] // 2

    @pl.when(i == 0)
    def _init():
        m_sc[...] = jnp.full_like(m_sc, _NEG_INF)
        l_sc[...] = jnp.zeros_like(l_sc)
        acc_sc[...] = jnp.zeros_like(acc_sc)

    # h1 = relu(h @ Wfc + bfc), h streamed as bf16, f32 accumulation.   (tile_n, 64)
    h1 = jnp.maximum(
        jnp.dot(h_ref[...], wfc_ref[...], preferred_element_type=jnp.float32)
        + bfc_ref[...], 0.0)

    # Fused Wa|Wb matmul -> split into tanh / sigmoid gates.            (tile_n, 2*attn)
    ag = jnp.dot(h1, wab_ref[...], preferred_element_type=jnp.float32) + bab_ref[...]
    a = jnp.tanh(ag[:, :attn_dim])
    g = jax.nn.sigmoid(ag[:, attn_dim:])
    agp = a * g                                                        # (tile_n, attn)

    # Attention scores directly in (n_classes, tile_n) layout:
    # scores[c, n] = sum_k wc[c, k] * agp[n, k] + bc[c]
    scores = jax.lax.dot_general(
        wc_ref[...], agp, (((1,), (1,)), ((), ())),
        preferred_element_type=jnp.float32) + bc_ref[...]              # (2, tile_n)
    a_raw_ref[...] = scores                                            # raw (pre-softmax)

    # Mask padded rows (global index >= n_valid).
    col = jax.lax.broadcasted_iota(jnp.int32, scores.shape, 1) + i * tile_n
    masked = jnp.where(col < nv_ref[0], scores, _NEG_INF)

    # Online (flash-style) softmax over instances, accumulated in scratch.
    m_prev = m_sc[...]
    m_new = jnp.maximum(m_prev, jnp.max(masked, axis=-1, keepdims=True))
    alpha = jnp.exp(m_prev - m_new)
    p = jnp.exp(masked - m_new)                                        # (2, tile_n)
    l_sc[...] = alpha * l_sc[...] + jnp.sum(p, axis=-1, keepdims=True)
    acc_sc[...] = alpha * acc_sc[...] + jnp.dot(
        p, h1, preferred_element_type=jnp.float32)                     # (2, 64)
    m_sc[...] = m_new

    # ------------------------- head epilogue (last step) -------------------------
    @pl.when(i == pl.num_programs(0) - 1)
    def _finalize():
        M = acc_sc[...] * pl.reciprocal(l_sc[...], approx=True)        # (2, 64)

        def inorm(x):
            mu = jnp.mean(x, axis=-1, keepdims=True)
            var = jnp.mean((x - mu) * (x - mu), axis=-1, keepdims=True)
            return (x - mu) * jax.lax.rsqrt(var + EPS)

        Mn = inorm(M)

        meta_h = jnp.maximum(
            jnp.dot(meta_ref[...], w1_ref[...], preferred_element_type=jnp.float32)
            + b1_ref[...], 0.0)                                        # (1, 32)
        # Dropout(p) -> identity at inference.
        meta = jnp.maximum(
            jnp.dot(meta_h, w2_ref[...], preferred_element_type=jnp.float32)
            + b2_ref[...], 0.0)                                        # (1, 64)
        meta = inorm(meta)

        fused = jnp.maximum(Mn, meta)                                  # 'max' fusion (2, 64)

        c = jnp.maximum(
            jnp.dot(fused, wf1_ref[...], preferred_element_type=jnp.float32)
            + bf1_ref[...], 0.0)                                       # (2, 32)
        c = jnp.maximum(
            jnp.dot(c, wf2_ref[...], preferred_element_type=jnp.float32)
            + bf2_ref[...], 0.0)                                       # (2, 32)

        # per-class heads: logits[0, k] = c[k] . wcls[k] + bcls[k]
        logits = jnp.sum(c * wcls_ref[...], axis=-1, keepdims=True).T + bcls_ref[...]
        logits_ref[...] = logits                                       # (1, 2)

        mx = jnp.max(logits, axis=-1, keepdims=True)
        e = jnp.exp(logits - mx)
        probs_ref[...] = e * pl.reciprocal(jnp.sum(e, axis=-1, keepdims=True), approx=True)


# ---------------------------------------------------------------------------
# Jitted wrapper: pads the bag to a lane-dense tile multiple, one pallas_call.
# ---------------------------------------------------------------------------
@functools.partial(jax.jit, static_argnames=("tile_n",))
def multimodal_clam_forward(h, metadata, clam_params, head_params, *, tile_n=1024):
    """Mirrors multimodal_clam.forward (instance_eval=False)."""
    n, in_dim = h.shape
    feat = clam_params["wfc"].shape[1]
    n_classes = clam_params["wc"].shape[0]

    # Tile: multiple of 128 lanes for lane-dense A_raw stores; bounded VMEM per step.
    tile = _round_up(min(tile_n, _round_up(n, 128)), 128)
    n_pad = _round_up(n, tile)
    grid = (n_pad // tile,)

    h_p = jnp.pad(h.astype(jnp.bfloat16), ((0, n_pad - n), (0, 0)))
    n_valid = jnp.array([n], dtype=jnp.int32)

    cp, hp = clam_params, head_params
    args = (h_p, cp["wfc"].astype(jnp.bfloat16), cp["bfc"], cp["wab"], cp["bab"],
            cp["wc"], cp["bc"],
            metadata, hp["w1"], hp["b1"], hp["w2"], hp["b2"],
            hp["wf1"], hp["bf1"], hp["wf2"], hp["bf2"], hp["wcls"], hp["bcls"])

    in_specs = [pl.BlockSpec((tile, in_dim), lambda i, nv: (i, 0))]
    in_specs += [_full_spec(a.shape) for a in args[1:]]

    out_shape = (jax.ShapeDtypeStruct((1, n_classes), jnp.float32),
                 jax.ShapeDtypeStruct((1, n_classes), jnp.float32),
                 jax.ShapeDtypeStruct((n_classes, n_pad), jnp.float32))
    out_specs = [
        _full_spec((1, n_classes)),
        _full_spec((1, n_classes)),
        pl.BlockSpec((n_classes, tile), lambda i, nv: (0, i)),
    ]

    scratch = [pltpu.VMEM((n_classes, 1), jnp.float32),      # running max
               pltpu.VMEM((n_classes, 1), jnp.float32),      # running denom
               pltpu.VMEM((n_classes, feat), jnp.float32)]   # running weighted sum

    logits, probs, a_raw_pad = pl.pallas_call(
        _fused_clam_head_kernel,
        out_shape=out_shape,
        grid_spec=pltpu.PrefetchScalarGridSpec(
            num_scalar_prefetch=1,
            grid=grid,
            in_specs=in_specs,
            out_specs=out_specs,
            scratch_shapes=scratch),
        compiler_params=pltpu.CompilerParams(
            dimension_semantics=("arbitrary",),
            vmem_limit_bytes=32 * 1024 * 1024),
    )(n_valid, *args)

    a_raw = a_raw_pad[:, :n]
    y_hat = jnp.argmax(logits, axis=1, keepdims=True)   # torch.topk(logits, 1, dim=1)[1]
    return logits, probs, y_hat, a_raw, {}


# ---------------------------------------------------------------------------
# Deterministic parameters, pure-jnp reference, example run
# ---------------------------------------------------------------------------
def _init_params(key, in_dim=32, clam_feat=64, attn_dim=16, n_classes=2,
                 num_neurons_meta=32, meta_out=64):
    ks = jax.random.split(key, 20)
    s = 0.1

    def w(k, shape):
        return (s * jax.random.normal(k, shape)).astype(jnp.float32)

    wa, ba = w(ks[2], (clam_feat, attn_dim)), w(ks[3], (1, attn_dim))
    wb, bb = w(ks[4], (clam_feat, attn_dim)), w(ks[5], (1, attn_dim))
    clam_params = {
        "wfc": w(ks[0], (in_dim, clam_feat)), "bfc": w(ks[1], (1, clam_feat)),
        "wab": jnp.concatenate([wa, wb], axis=1),     # fused Wa|Wb  (64, 2*attn)
        "bab": jnp.concatenate([ba, bb], axis=1),     # fused ba|bb  (1, 2*attn)
        "wc":  w(ks[6], (n_classes, attn_dim)),       # PyTorch Linear weight layout
        "bc":  w(ks[7], (n_classes, 1)),
    }
    head_params = {
        # metadata_head (fus_method='max' branch): Linear(3,32) ReLU Dropout Linear(32,64) ReLU
        "w1": w(ks[8], (3, num_neurons_meta)),  "b1": w(ks[9], (1, num_neurons_meta)),
        "w2": w(ks[10], (num_neurons_meta, meta_out)), "b2": w(ks[11], (1, meta_out)),
        # fc_layers (final_hidden_layers=2): Linear(64,32) ReLU Linear(32,32) ReLU
        "wf1": w(ks[12], (meta_out, 32)), "bf1": w(ks[13], (1, 32)),
        "wf2": w(ks[14], (32, 32)),       "bf2": w(ks[15], (1, 32)),
        # per-class bag classifiers: 2 x Linear(32, 1), stacked row-wise
        "wcls": w(ks[16], (n_classes, 32)), "bcls": w(ks[17], (1, n_classes)),
    }
    return clam_params, head_params


def _reference_forward(h, metadata, cp, hp):
    attn_dim = cp["wab"].shape[1] // 2
    h1 = jnp.maximum(h @ cp["wfc"] + cp["bfc"], 0.0)
    ag = h1 @ cp["wab"] + cp["bab"]
    agp = jnp.tanh(ag[:, :attn_dim]) * jax.nn.sigmoid(ag[:, attn_dim:])
    a_raw = (agp @ cp["wc"].T + cp["bc"].T).T                 # (n_classes, N)
    A = jax.nn.softmax(a_raw, axis=-1)
    M = A @ h1

    def inorm(x):
        mu = jnp.mean(x, -1, keepdims=True)
        var = jnp.mean((x - mu) ** 2, -1, keepdims=True)
        return (x - mu) * jax.lax.rsqrt(var + EPS)

    Mn = inorm(M)
    meta = jnp.maximum(metadata @ hp["w1"] + hp["b1"], 0.0)
    meta = jnp.maximum(meta @ hp["w2"] + hp["b2"], 0.0)
    meta = inorm(meta)
    fused = jnp.maximum(Mn, meta)
    c = jnp.maximum(fused @ hp["wf1"] + hp["bf1"], 0.0)
    c = jnp.maximum(c @ hp["wf2"] + hp["bf2"], 0.0)
    logits = jnp.sum(c * hp["wcls"], axis=-1, keepdims=True).T + hp["bcls"]
    return logits, jax.nn.softmax(logits, axis=-1), a_raw


if __name__ == "__main__":
    import numpy as np

    key = jax.random.PRNGKey(0)
    k_h, k_meta, k_par = jax.random.split(key, 3)

    N_INSTANCES, IN_DIM = 8, 32
    h = jax.random.normal(k_h, (N_INSTANCES, IN_DIM), dtype=jnp.float32)   # bag of patch feats
    metadata = jax.random.normal(k_meta, (1, 3), dtype=jnp.float32)        # 3 clinical scalars

    clam_params, head_params = _init_params(k_par, in_dim=IN_DIM)

    logits, Y_prob, Y_hat, A_raw, results = multimodal_clam_forward(
        h, metadata, clam_params, head_params)
    jax.block_until_ready((logits, Y_prob, Y_hat, A_raw))

    assert logits.shape == (1, 2) and Y_prob.shape == (1, 2)
    assert Y_hat.shape == (1, 1) and A_raw.shape == (2, N_INSTANCES)

    ref_logits, ref_probs, ref_a_raw = _reference_forward(h, metadata, clam_params, head_params)
    np.testing.assert_allclose(np.asarray(A_raw), np.asarray(ref_a_raw), atol=5e-2, rtol=5e-2)
    np.testing.assert_allclose(np.asarray(logits), np.asarray(ref_logits), atol=5e-2, rtol=5e-2)
    np.testing.assert_allclose(np.asarray(Y_prob), np.asarray(ref_probs), atol=5e-2, rtol=5e-2)

    print("KERNEL_OK")
</pallas_src>

<mosaic_0001>
module attributes {stable_mosaic.version = 11 : i64} {
  func.func @_fused_clam_head_kernel(%arg0: i32, %arg1: memref<1xi32, #tpu.memory_space<smem>>, %arg2: memref<128x32xbf16, #tpu.memory_space<vmem>>, %arg3: memref<32x64xbf16, #tpu.memory_space<vmem>>, %arg4: memref<1x64xf32, #tpu.memory_space<vmem>>, %arg5: memref<64x32xf32, #tpu.memory_space<vmem>>, %arg6: memref<1x32xf32, #tpu.memory_space<vmem>>, %arg7: memref<2x16xf32, #tpu.memory_space<vmem>>, %arg8: memref<2x1xf32, #tpu.memory_space<vmem>>, %arg9: memref<1x3xf32, #tpu.memory_space<vmem>>, %arg10: memref<3x32xf32, #tpu.memory_space<vmem>>, %arg11: memref<1x32xf32, #tpu.memory_space<vmem>>, %arg12: memref<32x64xf32, #tpu.memory_space<vmem>>, %arg13: memref<1x64xf32, #tpu.memory_space<vmem>>, %arg14: memref<64x32xf32, #tpu.memory_space<vmem>>, %arg15: memref<1x32xf32, #tpu.memory_space<vmem>>, %arg16: memref<32x32xf32, #tpu.memory_space<vmem>>, %arg17: memref<1x32xf32, #tpu.memory_space<vmem>>, %arg18: memref<2x32xf32, #tpu.memory_space<vmem>>, %arg19: memref<1x2xf32, #tpu.memory_space<vmem>>, %arg20: memref<1x2xf32, #tpu.memory_space<vmem>>, %arg21: memref<1x2xf32, #tpu.memory_space<vmem>>, %arg22: memref<2x128xf32, #tpu.memory_space<vmem>>, %arg23: memref<2x1xf32, #tpu.memory_space<vmem>>, %arg24: memref<2x1xf32, #tpu.memory_space<vmem>>, %arg25: memref<2x64xf32, #tpu.memory_space<vmem>>) attributes {dimension_semantics = [#tpu.dimension_semantics<arbitrary>], iteration_bounds = array<i64: 1>, scalar_prefetch = 1 : i64, scratch_operands = 3 : i64, tpu.core_type = #tpu.core_type<tc>, window_params = [{transform_indices = @transform_0, window_bounds = array<i64: 128, 32>}, {pipeline_mode = #tpu.pipeline_mode<synchronous>, transform_indices = @transform_1, window_bounds = array<i64: 32, 64>}, {pipeline_mode = #tpu.pipeline_mode<synchronous>, transform_indices = @transform_2, window_bounds = array<i64: 1, 64>}, {pipeline_mode = #tpu.pipeline_mode<synchronous>, transform_indices = @transform_3, window_bounds = array<i64: 64, 32>}, {pipeline_mode = #tpu.pipeline_mode<synchronous>, transform_indices = @transform_4, window_bounds = array<i64: 1, 32>}, {pipeline_mode = #tpu.pipeline_mode<synchronous>, transform_indices = @transform_5, window_bounds = array<i64: 2, 16>}, {pipeline_mode = #tpu.pipeline_mode<synchronous>, transform_indices = @transform_6, window_bounds = array<i64: 2, 1>}, {pipeline_mode = #tpu.pipeline_mode<synchronous>, transform_indices = @transform_7, window_bounds = array<i64: 1, 3>}, {pipeline_mode = #tpu.pipeline_mode<synchronous>, transform_indices = @transform_8, window_bounds = array<i64: 3, 32>}, {pipeline_mode = #tpu.pipeline_mode<synchronous>, transform_indices = @transform_9, window_bounds = array<i64: 1, 32>}, {pipeline_mode = #tpu.pipeline_mode<synchronous>, transform_indices = @transform_10, window_bounds = array<i64: 32, 64>}, {pipeline_mode = #tpu.pipeline_mode<synchronous>, transform_indices = @transform_11, window_bounds = array<i64: 1, 64>}, {pipeline_mode = #tpu.pipeline_mode<synchronous>, transform_indices = @transform_12, window_bounds = array<i64: 64, 32>}, {pipeline_mode = #tpu.pipeline_mode<synchronous>, transform_indices = @transform_13, window_bounds = array<i64: 1, 32>}, {pipeline_mode = #tpu.pipeline_mode<synchronous>, transform_indices = @transform_14, window_bounds = array<i64: 32, 32>}, {pipeline_mode = #tpu.pipeline_mode<synchronous>, transform_indices = @transform_15, window_bounds = array<i64: 1, 32>}, {pipeline_mode = #tpu.pipeline_mode<synchronous>, transform_indices = @transform_16, window_bounds = array<i64: 2, 32>}, {pipeline_mode = #tpu.pipeline_mode<synchronous>, transform_indices = @transform_17, window_bounds = array<i64: 1, 2>}, {pipeline_mode = #tpu.pipeline_mode<synchronous>, transform_indices = @transform_18, window_bounds = array<i64: 1, 2>}, {pipeline_mode = #tpu.pipeline_mode<synchronous>, transform_indices = @transform_19, window_bounds = array<i64: 1, 2>}, {transform_indices = @transform_20, window_bounds = array<i64: 2, 128>}]} {
    %c0_i32 = arith.constant 0 : i32
    %0 = arith.cmpi eq, %arg0, %c0_i32 : i32
    %1 = arith.extui %0 : i1 to i32
    %c0_i32_0 = arith.constant 0 : i32
    %2 = arith.cmpi ne, %1, %c0_i32_0 : i32
    scf.if %2 {
      %cst_39 = arith.constant -1.000000e+30 : f32
      %65 = vector.broadcast %cst_39 : f32 to vector<2x1xf32>
      %c0_40 = arith.constant 0 : index
      %c0_41 = arith.constant 0 : index
      %66 = vector.load %arg23[%c0_40, %c0_41] : memref<2x1xf32, #tpu.memory_space<vmem>>, vector<2x1xf32>
      tpu.vector_store %arg23[%c0_40, %c0_41], %65 {strides = array<i32>} : memref<2x1xf32, #tpu.memory_space<vmem>>, vector<2x1xf32>,
      %cst_42 = arith.constant 0.000000e+00 : f32
      %67 = vector.broadcast %cst_42 : f32 to vector<2x1xf32>
      %c0_43 = arith.constant 0 : index
      %c0_44 = arith.constant 0 : index
      %68 = vector.load %arg24[%c0_43, %c0_44] : memref<2x1xf32, #tpu.memory_space<vmem>>, vector<2x1xf32>
      tpu.vector_store %arg24[%c0_43, %c0_44], %67 {strides = array<i32>} : memref<2x1xf32, #tpu.memory_space<vmem>>, vector<2x1xf32>,
      %cst_45 = arith.constant 0.000000e+00 : f32
      %69 = vector.broadcast %cst_45 : f32 to vector<2x64xf32>
      %c0_46 = arith.constant 0 : index
      %c0_47 = arith.constant 0 : index
      %70 = vector.load %arg25[%c0_46, %c0_47] : memref<2x64xf32, #tpu.memory_space<vmem>>, vector<2x64xf32>
      tpu.vector_store %arg25[%c0_46, %c0_47], %69 {strides = array<i32>} : memref<2x64xf32, #tpu.memory_space<vmem>>, vector<2x64xf32>,
    } else {
    }
    %c0 = arith.constant 0 : index
    %c0_1 = arith.constant 0 : index
    %3 = vector.load %arg2[%c0, %c0_1] : memref<128x32xbf16, #tpu.memory_space<vmem>>, vector<128x32xbf16>
    %c0_2 = arith.constant 0 : index
    %c0_3 = arith.constant 0 : index
    %4 = vector.load %arg3[%c0_2, %c0_3] : memref<32x64xbf16, #tpu.memory_space<vmem>>, vector<32x64xbf16>
    %cst = arith.constant dense<0.000000e+00> : vector<128x64xf32>
    %5 = tpu.matmul %3, %4, %cst {dimension_numbers = #tpu.dot_dimension_numbers<[1], [0], [0], [1], [0, 0, 1, 1], [], []>} : vector<128x32xbf16>, vector<32x64xbf16>, vector<128x64xf32> -> vector<128x64xf32>
    %c0_4 = arith.constant 0 : index
    %c0_5 = arith.constant 0 : index
    %6 = vector.load %arg4[%c0_4, %c0_5] : memref<1x64xf32, #tpu.memory_space<vmem>>, vector<1x64xf32>
    %7 = vector.broadcast %6 : vector<1x64xf32> to vector<128x64xf32>
    %8 = arith.addf %5, %7 : vector<128x64xf32>
    %cst_6 = arith.constant 0.000000e+00 : f32
    %9 = vector.broadcast %cst_6 : f32 to vector<128x64xf32>
    %10 = arith.maximumf %8, %9 : vector<128x64xf32>
    %c0_7 = arith.constant 0 : index
    %c0_8 = arith.constant 0 : index
    %11 = vector.load %arg5[%c0_7, %c0_8] : memref<64x32xf32, #tpu.memory_space<vmem>>, vector<64x32xf32>
    %cst_9 = arith.constant dense<0.000000e+00> : vector<128x32xf32>
    %12 = tpu.matmul %10, %11, %cst_9 {dimension_numbers = #tpu.dot_dimension_numbers<[1], [0], [0], [1], [0, 0, 1, 1], [], []>} : vector<128x64xf32>, vector<64x32xf32>, vector<128x32xf32> -> vector<128x32xf32>
    %c0_10 = arith.constant 0 : index
    %c0_11 = arith.constant 0 : index
    %13 = vector.load %arg6[%c0_10, %c0_11] : memref<1x32xf32, #tpu.memory_space<vmem>>, vector<1x32xf32>
    %14 = vector.broadcast %13 : vector<1x32xf32> to vector<128x32xf32>
    %15 = arith.addf %12, %14 : vector<128x32xf32>
    %16 = vector.extract_strided_slice %15 {offsets = [0, 0], sizes = [128, 16], strides = [1, 1]} : vector<128x32xf32> to vector<128x16xf32>
    %17 = math.tanh %16 : vector<128x16xf32>
    %18 = vector.extract_strided_slice %15 {offsets = [0, 16], sizes = [128, 16], strides = [1, 1]} : vector<128x32xf32> to vector<128x16xf32>
    %19 = arith.negf %18 : vector<128x16xf32>
    %20 = math.exp %19 : vector<128x16xf32>
    %cst_12 = arith.constant 1.000000e+00 : f32
    %21 = vector.broadcast %cst_12 : f32 to vector<128x16xf32>
    %22 = arith.addf %21, %20 : vector<128x16xf32>
    %23 = arith.divf %21, %22 : vector<128x16xf32>
    %24 = arith.mulf %17, %23 : vector<128x16xf32>
    %c0_13 = arith.constant 0 : index
    %c0_14 = arith.constant 0 : index
    %25 = vector.load %arg7[%c0_13, %c0_14] : memref<2x16xf32, #tpu.memory_space<vmem>>, vector<2x16xf32>
    %cst_15 = arith.constant dense<0.000000e+00> : vector<2x128xf32>
    %26 = tpu.matmul %25, %24, %cst_15 {dimension_numbers = #tpu.dot_dimension_numbers<[1], [1], [0], [0], [0, 0, 1, 0], [], []>} : vector<2x16xf32>, vector<128x16xf32>, vector<2x128xf32> -> vector<2x128xf32>
    %c0_16 = arith.constant 0 : index
    %c0_17 = arith.constant 0 : index
    %27 = vector.load %arg8[%c0_16, %c0_17] : memref<2x1xf32, #tpu.memory_space<vmem>>, vector<2x1xf32>
    %28 = vector.broadcast %27 : vector<2x1xf32> to vector<2x128xf32>
    %29 = arith.addf %26, %28 : vector<2x128xf32>
    %c0_18 = arith.constant 0 : index
    %c0_19 = arith.constant 0 : index
    %30 = vector.load %arg22[%c0_18, %c0_19] : memref<2x128xf32, #tpu.memory_space<vmem>>, vector<2x128xf32>
    tpu.vector_store %arg22[%c0_18, %c0_19], %29 {strides = array<i32>} : memref<2x128xf32, #tpu.memory_space<vmem>>, vector<2x128xf32>,
    %31 = tpu.iota {dimensions = array<i32: 1>} : vector<2x128xi32>
    %c128_i32 = arith.constant 128 : i32
    %32 = arith.muli %arg0, %c128_i32 : i32
    %33 = vector.broadcast %32 : i32 to vector<2x128xi32>
    %34 = arith.addi %31, %33 : vector<2x128xi32>
    %c0_20 = arith.constant 0 : index
    %35 = memref.load %arg1[%c0_20] : memref<1xi32, #tpu.memory_space<smem>>
    %36 = vector.broadcast %35 : i32 to vector<2x128xi32>
    %37 = arith.cmpi slt, %34, %36 : vector<2x128xi32>
    %cst_21 = arith.constant -1.000000e+30 : f32
    %38 = vector.broadcast %cst_21 : f32 to vector<2x128xf32>
    %39 = arith.select %37, %29, %38 : vector<2x128xi1>, vector<2x128xf32>
    %c0_22 = arith.constant 0 : index
    %c0_23 = arith.constant 0 : index
    %40 = vector.load %arg23[%c0_22, %c0_23] : memref<2x1xf32, #tpu.memory_space<vmem>>, vector<2x1xf32>
    %cst_24 = arith.constant dense<0xFF800000> : vector<2xf32>
    %41 = vector.multi_reduction <maximumf>, %39, %cst_24 [1] : vector<2x128xf32> to vector<2xf32>
    %42 = vector.shape_cast %41 : vector<2xf32> to vector<2x1xf32>
    %43 = arith.maximumf %40, %42 : vector<2x1xf32>
    %44 = arith.subf %40, %43 : vector<2x1xf32>
    %45 = math.exp %44 : vector<2x1xf32>
    %46 = vector.broadcast %43 : vector<2x1xf32> to vector<2x128xf32>
    %47 = arith.subf %39, %46 : vector<2x128xf32>
    %48 = math.exp %47 : vector<2x128xf32>
    %c0_25 = arith.constant 0 : index
    %c0_26 = arith.constant 0 : index
    %49 = vector.load %arg24[%c0_25, %c0_26] : memref<2x1xf32, #tpu.memory_space<vmem>>, vector<2x1xf32>
    %50 = arith.mulf %45, %49 : vector<2x1xf32>
    %cst_27 = arith.constant dense<0.000000e+00> : vector<2xf32>
    %51 = vector.multi_reduction <add>, %48, %cst_27 [1] : vector<2x128xf32> to vector<2xf32>
    %52 = vector.shape_cast %51 : vector<2xf32> to vector<2x1xf32>
    %53 = arith.addf %50, %52 : vector<2x1xf32>
    %c0_28 = arith.constant 0 : index
    %c0_29 = arith.constant 0 : index
    %54 = vector.load %arg24[%c0_28, %c0_29] : memref<2x1xf32, #tpu.memory_space<vmem>>, vector<2x1xf32>
    tpu.vector_store %arg24[%c0_28, %c0_29], %53 {strides = array<i32>} : memref<2x1xf32, #tpu.memory_space<vmem>>, vector<2x1xf32>,
    %c0_30 = arith.constant 0 : index
    %c0_31 = arith.constant 0 : index
    %55 = vector.load %arg25[%c0_30, %c0_31] : memref<2x64xf32, #tpu.memory_space<vmem>>, vector<2x64xf32>
    %56 = vector.broadcast %45 : vector<2x1xf32> to vector<2x64xf32>
    %57 = arith.mulf %56, %55 : vector<2x64xf32>
    %cst_32 = arith.constant dense<0.000000e+00> : vector<2x64xf32>
    %58 = tpu.matmul %48, %10, %cst_32 {dimension_numbers = #tpu.dot_dimension_numbers<[1], [0], [0], [1], [0, 0, 1, 1], [], []>} : vector<2x128xf32>, vector<128x64xf32>, vector<2x64xf32> -> vector<2x64xf32>
    %59 = arith.addf %57, %58 : vector<2x64xf32>
    %c0_33 = arith.constant 0 : index
    %c0_34 = arith.constant 0 : index
    %60 = vector.load %arg25[%c0_33, %c0_34] : memref<2x64xf32, #tpu.memory_space<vmem>>, vector<2x64xf32>
    tpu.vector_store %arg25[%c0_33, %c0_34], %59 {strides = array<i32>} : memref<2x64xf32, #tpu.memory_space<vmem>>, vector<2x64xf32>,
    %c0_35 = arith.constant 0 : index
    %c0_36 = arith.constant 0 : index
    %61 = vector.load %arg23[%c0_35, %c0_36] : memref<2x1xf32, #tpu.memory_space<vmem>>, vector<2x1xf32>
    tpu.vector_store %arg23[%c0_35, %c0_36], %43 {strides = array<i32>} : memref<2x1xf32, #tpu.memory_space<vmem>>, vector<2x1xf32>,
    %c0_i32_37 = arith.constant 0 : i32
    %62 = arith.cmpi eq, %arg0, %c0_i32_37 : i32
    %63 = arith.extui %62 : i1 to i32
    %c0_i32_38 = arith.constant 0 : i32
    %64 = arith.cmpi ne, %63, %c0_i32_38 : i32
    scf.if %64 {
      %c0_39 = arith.constant 0 : index
      %c0_40 = arith.constant 0 : index
      %65 = vector.load %arg25[%c0_39, %c0_40] : memref<2x64xf32, #tpu.memory_space<vmem>>, vector<2x64xf32>
      %c0_41 = arith.constant 0 : index
      %c0_42 = arith.constant 0 : index
      %66 = vector.load %arg24[%c0_41, %c0_42] : memref<2x1xf32, #tpu.memory_space<vmem>>, vector<2x1xf32>
      %67 = tpu.reciprocal %66 {approx = true} : vector<2x1xf32> -> vector<2x1xf32>
      %68 = vector.broadcast %67 : vector<2x1xf32> to vector<2x64xf32>
      %69 = arith.mulf %65, %68 : vector<2x64xf32>
      %cst_43 = arith.constant dense<0.000000e+00> : vector<2xf32>
      %70 = vector.multi_reduction <add>, %69, %cst_43 [1] : vector<2x64xf32> to vector<2xf32>
      %71 = vector.shape_cast %70 : vector<2xf32> to vector<2x1xf32>
      %cst_44 = arith.constant 6.400000e+01 : f32
      %72 = vector.broadcast %cst_44 : f32 to vector<2x1xf32>
      %73 = arith.divf %71, %72 : vector<2x1xf32>
      %74 = vector.broadcast %73 : vector<2x1xf32> to vector<2x64xf32>
      %75 = arith.subf %69, %74 : vector<2x64xf32>
      %76 = vector.broadcast %73 : vector<2x1xf32> to vector<2x64xf32>
      %77 = arith.subf %69, %76 : vector<2x64xf32>
      %78 = arith.mulf %75, %77 : vector<2x64xf32>
      %cst_45 = arith.constant dense<0.000000e+00> : vector<2xf32>
      %79 = vector.multi_reduction <add>, %78, %cst_45 [1] : vector<2x64xf32> to vector<2xf32>
      %80 = vector.shape_cast %79 : vector<2xf32> to vector<2x1xf32>
      %cst_46 = arith.constant 6.400000e+01 : f32
      %81 = vector.broadcast %cst_46 : f32 to vector<2x1xf32>
      %82 = arith.divf %80, %81 : vector<2x1xf32>
      %83 = vector.broadcast %73 : vector<2x1xf32> to vector<2x64xf32>
      %84 = arith.subf %69, %83 : vector<2x64xf32>
      %cst_47 = arith.constant 9.99999974E-6 : f32
      %85 = vector.broadcast %cst_47 : f32 to vector<2x1xf32>
      %86 = arith.addf %82, %85 : vector<2x1xf32>
      %87 = math.rsqrt %86 : vector<2x1xf32>
      %88 = vector.broadcast %87 : vector<2x1xf32> to vector<2x64xf32>
      %89 = arith.mulf %84, %88 : vector<2x64xf32>
      %c0_48 = arith.constant 0 : index
      %c0_49 = arith.constant 0 : index
      %90 = vector.load %arg9[%c0_48, %c0_49] : memref<1x3xf32, #tpu.memory_space<vmem>>, vector<1x3xf32>
      %c0_50 = arith.constant 0 : index
      %c0_51 = arith.constant 0 : index
      %91 = vector.load %arg10[%c0_50, %c0_51] : memref<3x32xf32, #tpu.memory_space<vmem>>, vector<3x32xf32>
      %cst_52 = arith.constant dense<0.000000e+00> : vector<1x32xf32>
      %92 = tpu.matmul %90, %91, %cst_52 {dimension_numbers = #tpu.dot_dimension_numbers<[1], [0], [0], [1], [0, 0, 1, 1], [], []>} : vector<1x3xf32>, vector<3x32xf32>, vector<1x32xf32> -> vector<1x32xf32>
      %c0_53 = arith.constant 0 : index
      %c0_54 = arith.constant 0 : index
      %93 = vector.load %arg11[%c0_53, %c0_54] : memref<1x32xf32, #tpu.memory_space<vmem>>, vector<1x32xf32>
      %94 = arith.addf %92, %93 : vector<1x32xf32>
      %cst_55 = arith.constant 0.000000e+00 : f32
      %95 = vector.broadcast %cst_55 : f32 to vector<1x32xf32>
      %96 = arith.maximumf %94, %95 : vector<1x32xf32>
      %c0_56 = arith.constant 0 : index
      %c0_57 = arith.constant 0 : index
      %97 = vector.load %arg12[%c0_56, %c0_57] : memref<32x64xf32, #tpu.memory_space<vmem>>, vector<32x64xf32>
      %cst_58 = arith.constant dense<0.000000e+00> : vector<1x64xf32>
      %98 = tpu.matmul %96, %97, %cst_58 {dimension_numbers = #tpu.dot_dimension_numbers<[1], [0], [0], [1], [0, 0, 1, 1], [], []>} : vector<1x32xf32>, vector<32x64xf32>, vector<1x64xf32> -> vector<1x64xf32>
      %c0_59 = arith.constant 0 : index
      %c0_60 = arith.constant 0 : index
      %99 = vector.load %arg13[%c0_59, %c0_60] : memref<1x64xf32, #tpu.memory_space<vmem>>, vector<1x64xf32>
      %100 = arith.addf %98, %99 : vector<1x64xf32>
      %cst_61 = arith.constant 0.000000e+00 : f32
      %101 = vector.broadcast %cst_61 : f32 to vector<1x64xf32>
      %102 = arith.maximumf %100, %101 : vector<1x64xf32>
      %cst_62 = arith.constant dense<0.000000e+00> : vector<1xf32>
      %103 = vector.multi_reduction <add>, %102, %cst_62 [1] : vector<1x64xf32> to vector<1xf32>
      %104 = vector.shape_cast %103 : vector<1xf32> to vector<1x1xf32>
      %cst_63 = arith.constant 6.400000e+01 : f32
      %105 = vector.broadcast %cst_63 : f32 to vector<1x1xf32>
      %106 = arith.divf %104, %105 : vector<1x1xf32>
      %107 = vector.broadcast %106 : vector<1x1xf32> to vector<1x64xf32>
      %108 = arith.subf %102, %107 : vector<1x64xf32>
      %109 = vector.broadcast %106 : vector<1x1xf32> to vector<1x64xf32>
      %110 = arith.subf %102, %109 : vector<1x64xf32>
      %111 = arith.mulf %108, %110 : vector<1x64xf32>
      %cst_64 = arith.constant dense<0.000000e+00> : vector<1xf32>
      %112 = vector.multi_reduction <add>, %111, %cst_64 [1] : vector<1x64xf32> to vector<1xf32>
      %113 = vector.shape_cast %112 : vector<1xf32> to vector<1x1xf32>
      %cst_65 = arith.constant 6.400000e+01 : f32
      %114 = vector.broadcast %cst_65 : f32 to vector<1x1xf32>
      %115 = arith.divf %113, %114 : vector<1x1xf32>
      %116 = vector.broadcast %106 : vector<1x1xf32> to vector<1x64xf32>
      %117 = arith.subf %102, %116 : vector<1x64xf32>
      %cst_66 = arith.constant 9.99999974E-6 : f32
      %118 = vector.broadcast %cst_66 : f32 to vector<1x1xf32>
      %119 = arith.addf %115, %118 : vector<1x1xf32>
      %120 = math.rsqrt %119 : vector<1x1xf32>
      %121 = vector.broadcast %120 : vector<1x1xf32> to vector<1x64xf32>
      %122 = arith.mulf %117, %121 : vector<1x64xf32>
      %123 = vector.broadcast %122 : vector<1x64xf32> to vector<2x64xf32>
      %124 = arith.maximumf %89, %123 : vector<2x64xf32>
      %c0_67 = arith.constant 0 : index
      %c0_68 = arith.constant 0 : index
      %125 = vector.load %arg14[%c0_67, %c0_68] : memref<64x32xf32, #tpu.memory_space<vmem>>, vector<64x32xf32>
      %cst_69 = arith.constant dense<0.000000e+00> : vector<2x32xf32>
      %126 = tpu.matmul %124, %125, %cst_69 {dimension_numbers = #tpu.dot_dimension_numbers<[1], [0], [0], [1], [0, 0, 1, 1], [], []>} : vector<2x64xf32>, vector<64x32xf32>, vector<2x32xf32> -> vector<2x32xf32>
      %c0_70 = arith.constant 0 : index
      %c0_71 = arith.constant 0 : index
      %127 = vector.load %arg15[%c0_70, %c0_71] : memref<1x32xf32, #tpu.memory_space<vmem>>, vector<1x32xf32>
      %128 = vector.broadcast %127 : vector<1x32xf32> to vector<2x32xf32>
      %129 = arith.addf %126, %128 : vector<2x32xf32>
      %cst_72 = arith.constant 0.000000e+00 : f32
      %130 = vector.broadcast %cst_72 : f32 to vector<2x32xf32>
      %131 = arith.maximumf %129, %130 : vector<2x32xf32>
      %c0_73 = arith.constant 0 : index
      %c0_74 = arith.constant 0 : index
      %132 = vector.load %arg16[%c0_73, %c0_74] : memref<32x32xf32, #tpu.memory_space<vmem>>, vector<32x32xf32>
      %cst_75 = arith.constant dense<0.000000e+00> : vector<2x32xf32>
      %133 = tpu.matmul %131, %132, %cst_75 {dimension_numbers = #tpu.dot_dimension_numbers<[1], [0], [0], [1], [0, 0, 1, 1], [], []>} : vector<2x32xf32>, vector<32x32xf32>, vector<2x32xf32> -> vector<2x32xf32>
      %c0_76 = arith.constant 0 : index
      %c0_77 = arith.constant 0 : index
      %134 = vector.load %arg17[%c0_76, %c0_77] : memref<1x32xf32, #tpu.memory_space<vmem>>, vector<1x32xf32>
      %135 = vector.broadcast %134 : vector<1x32xf32> to vector<2x32xf32>
      %136 = arith.addf %133, %135 : vector<2x32xf32>
      %cst_78 = arith.constant 0.000000e+00 : f32
      %137 = vector.broadcast %cst_78 : f32 to vector<2x32xf32>
      %138 = arith.maximumf %136, %137 : vector<2x32xf32>
      %c0_79 = arith.constant 0 : index
      %c0_80 = arith.constant 0 : index
      %139 = vector.load %arg18[%c0_79, %c0_80] : memref<2x32xf32, #tpu.memory_space<vmem>>, vector<2x32xf32>
      %140 = arith.mulf %138, %139 : vector<2x32xf32>
      %cst_81 = arith.constant dense<0.000000e+00> : vector<2xf32>
      %141 = vector.multi_reduction <add>, %140, %cst_81 [1] : vector<2x32xf32> to vector<2xf32>
      %142 = vector.shape_cast %141 : vector<2xf32> to vector<2x1xf32>
      %143 = tpu.transpose %142, [1, 0] : vector<2x1xf32> -> vector<1x2xf32>
      %c0_82 = arith.constant 0 : index
      %c0_83 = arith.constant 0 : index
      %144 = vector.load %arg19[%c0_82, %c0_83] : memref<1x2xf32, #tpu.memory_space<vmem>>, vector<1x2xf32>
      %145 = arith.addf %143, %144 : vector<1x2xf32>
      %c0_84 = arith.constant 0 : index
      %c0_85 = arith.constant 0 : index
      %146 = vector.load %arg20[%c0_84, %c0_85] : memref<1x2xf32, #tpu.memory_space<vmem>>, vector<1x2xf32>
      tpu.vector_store %arg20[%c0_84, %c0_85], %145 {strides = array<i32>} : memref<1x2xf32, #tpu.memory_space<vmem>>, vector<1x2xf32>,
      %cst_86 = arith.constant dense<0xFF800000> : vector<1xf32>
      %147 = vector.multi_reduction <maximumf>, %145, %cst_86 [1] : vector<1x2xf32> to vector<1xf32>
      %148 = vector.shape_cast %147 : vector<1xf32> to vector<1x1xf32>
      %149 = vector.broadcast %148 : vector<1x1xf32> to vector<1x2xf32>
      %150 = arith.subf %145, %149 : vector<1x2xf32>
      %151 = math.exp %150 : vector<1x2xf32>
      %cst_87 = arith.constant dense<0.000000e+00> : vector<1xf32>
      %152 = vector.multi_reduction <add>, %151, %cst_87 [1] : vector<1x2xf32> to vector<1xf32>
      %153 = vector.shape_cast %152 : vector<1xf32> to vector<1x1xf32>
      %154 = tpu.reciprocal %153 {approx = true} : vector<1x1xf32> -> vector<1x1xf32>
      %155 = vector.broadcast %154 : vector<1x1xf32> to vector<1x2xf32>
      %156 = arith.mulf %151, %155 : vector<1x2xf32>
      %c0_88 = arith.constant 0 : index
      %c0_89 = arith.constant 0 : index
      %157 = vector.load %arg21[%c0_88, %c0_89] : memref<1x2xf32, #tpu.memory_space<vmem>>, vector<1x2xf32>
      tpu.vector_store %arg21[%c0_88, %c0_89], %156 {strides = array<i32>} : memref<1x2xf32, #tpu.memory_space<vmem>>, vector<1x2xf32>,
    } else {
    }
    return
  }
  func.func @transform_0(%arg0: i32, %arg1: memref<1xi32, #tpu.memory_space<smem>>) -> (i32, i32) {
    %c0_i32 = arith.constant 0 : i32
    %c0_i32_0 = arith.constant 0 : i32
    return %arg0, %c0_i32 : i32, i32
  }
  func.func @transform_1(%arg0: i32, %arg1: memref<1xi32, #tpu.memory_space<smem>>) -> (i32, i32) {
    %c0_i32 = arith.constant 0 : i32
    %c0_i32_0 = arith.constant 0 : i32
    %c0_i32_1 = arith.constant 0 : i32
    return %c0_i32, %c0_i32_0 : i32, i32
  }
  func.func @transform_2(%arg0: i32, %arg1: memref<1xi32, #tpu.memory_space<smem>>) -> (i32, i32) {
    %c0_i32 = arith.constant 0 : i32
    %c0_i32_0 = arith.constant 0 : i32
    %c0_i32_1 = arith.constant 0 : i32
    return %c0_i32, %c0_i32_0 : i32, i32
  }
  func.func @transform_3(%arg0: i32, %arg1: memref<1xi32, #tpu.memory_space<smem>>) -> (i32, i32) {
    %c0_i32 = arith.constant 0 : i32
    %c0_i32_0 = arith.constant 0 : i32
    %c0_i32_1 = arith.constant 0 : i32
    return %c0_i32, %c0_i32_0 : i32, i32
  }
  func.func @transform_4(%arg0: i32, %arg1: memref<1xi32, #tpu.memory_space<smem>>) -> (i32, i32) {
    %c0_i32 = arith.constant 0 : i32
    %c0_i32_0 = arith.constant 0 : i32
    %c0_i32_1 = arith.constant 0 : i32
    return %c0_i32, %c0_i32_0 : i32, i32
  }
  func.func @transform_5(%arg0: i32, %arg1: memref<1xi32, #tpu.memory_space<smem>>) -> (i32, i32) {
    %c0_i32 = arith.constant 0 : i32
    %c0_i32_0 = arith.constant 0 : i32
    %c0_i32_1 = arith.constant 0 : i32
    return %c0_i32, %c0_i32_0 : i32, i32
  }
  func.func @transform_6(%arg0: i32, %arg1: memref<1xi32, #tpu.memory_space<smem>>) -> (i32, i32) {
    %c0_i32 = arith.constant 0 : i32
    %c0_i32_0 = arith.constant 0 : i32
    %c0_i32_1 = arith.constant 0 : i32
    return %c0_i32, %c0_i32_0 : i32, i32
  }
  func.func @transform_7(%arg0: i32, %arg1: memref<1xi32, #tpu.memory_space<smem>>) -> (i32, i32) {
    %c0_i32 = arith.constant 0 : i32
    %c0_i32_0 = arith.constant 0 : i32
    %c0_i32_1 = arith.constant 0 : i32
    return %c0_i32, %c0_i32_0 : i32, i32
  }
  func.func @transform_8(%arg0: i32, %arg1: memref<1xi32, #tpu.memory_space<smem>>) -> (i32, i32) {
    %c0_i32 = arith.constant 0 : i32
    %c0_i32_0 = arith.constant 0 : i32
    %c0_i32_1 = arith.constant 0 : i32
    return %c0_i32, %c0_i32_0 : i32, i32
  }
  func.func @transform_9(%arg0: i32, %arg1: memref<1xi32, #tpu.memory_space<smem>>) -> (i32, i32) {
    %c0_i32 = arith.constant 0 : i32
    %c0_i32_0 = arith.constant 0 : i32
    %c0_i32_1 = arith.constant 0 : i32
    return %c0_i32, %c0_i32_0 : i32, i32
  }
  func.func @transform_10(%arg0: i32, %arg1: memref<1xi32, #tpu.memory_space<smem>>) -> (i32, i32) {
    %c0_i32 = arith.constant 0 : i32
    %c0_i32_0 = arith.constant 0 : i32
    %c0_i32_1 = arith.constant 0 : i32
    return %c0_i32, %c0_i32_0 : i32, i32
  }
  func.func @transform_11(%arg0: i32, %arg1: memref<1xi32, #tpu.memory_space<smem>>) -> (i32, i32) {
    %c0_i32 = arith.constant 0 : i32
    %c0_i32_0 = arith.constant 0 : i32
    %c0_i32_1 = arith.constant 0 : i32
    return %c0_i32, %c0_i32_0 : i32, i32
  }
  func.func @transform_12(%arg0: i32, %arg1: memref<1xi32, #tpu.memory_space<smem>>) -> (i32, i32) {
    %c0_i32 = arith.constant 0 : i32
    %c0_i32_0 = arith.constant 0 : i32
    %c0_i32_1 = arith.constant 0 : i32
    return %c0_i32, %c0_i32_0 : i32, i32
  }
  func.func @transform_13(%arg0: i32, %arg1: memref<1xi32, #tpu.memory_space<smem>>) -> (i32, i32) {
    %c0_i32 = arith.constant 0 : i32
    %c0_i32_0 = arith.constant 0 : i32
    %c0_i32_1 = arith.constant 0 : i32
    return %c0_i32, %c0_i32_0 : i32, i32
  }
  func.func @transform_14(%arg0: i32, %arg1: memref<1xi32, #tpu.memory_space<smem>>) -> (i32, i32) {
    %c0_i32 = arith.constant 0 : i32
    %c0_i32_0 = arith.constant 0 : i32
    %c0_i32_1 = arith.constant 0 : i32
    return %c0_i32, %c0_i32_0 : i32, i32
  }
  func.func @transform_15(%arg0: i32, %arg1: memref<1xi32, #tpu.memory_space<smem>>) -> (i32, i32) {
    %c0_i32 = arith.constant 0 : i32
    %c0_i32_0 = arith.constant 0 : i32
    %c0_i32_1 = arith.constant 0 : i32
    return %c0_i32, %c0_i32_0 : i32, i32
  }
  func.func @transform_16(%arg0: i32, %arg1: memref<1xi32, #tpu.memory_space<smem>>) -> (i32, i32) {
    %c0_i32 = arith.constant 0 : i32
    %c0_i32_0 = arith.constant 0 : i32
    %c0_i32_1 = arith.constant 0 : i32
    return %c0_i32, %c0_i32_0 : i32, i32
  }
  func.func @transform_17(%arg0: i32, %arg1: memref<1xi32, #tpu.memory_space<smem>>) -> (i32, i32) {
    %c0_i32 = arith.constant 0 : i32
    %c0_i32_0 = arith.constant 0 : i32
    %c0_i32_1 = arith.constant 0 : i32
    return %c0_i32, %c0_i32_0 : i32, i32
  }
  func.func @transform_18(%arg0: i32, %arg1: memref<1xi32, #tpu.memory_space<smem>>) -> (i32, i32) {
    %c0_i32 = arith.constant 0 : i32
    %c0_i32_0 = arith.constant 0 : i32
    %c0_i32_1 = arith.constant 0 : i32
    return %c0_i32, %c0_i32_0 : i32, i32
  }
  func.func @transform_19(%arg0: i32, %arg1: memref<1xi32, #tpu.memory_space<smem>>) -> (i32, i32) {
    %c0_i32 = arith.constant 0 : i32
    %c0_i32_0 = arith.constant 0 : i32
    %c0_i32_1 = arith.constant 0 : i32
    return %c0_i32, %c0_i32_0 : i32, i32
  }
  func.func @transform_20(%arg0: i32, %arg1: memref<1xi32, #tpu.memory_space<smem>>) -> (i32, i32) {
    %c0_i32 = arith.constant 0 : i32
    %c0_i32_0 = arith.constant 0 : i32
    return %c0_i32, %arg0 : i32, i32
  }
}

</mosaic_0001>

<bundles_post_ra>
// kernel: multimodal_clam_forward.1
= control target key start
LH: loop header
LB: loop body
LE: loop exit
PB: predicated region body
PF: predicated region fallthrough
CT: control target
= control target key end

     0   :  { %s2527_s0 = inlined_call_operand.<no memory space> [shape: s32[1], index: 0, kind: input, shape index: {}]   ;;  %s2528_s1 = inlined_call_operand.vmem [shape: bf16[128,32], index: 1, kind: input, shape index: {}]   ;;  %s2529_s2 = inlined_call_operand.vmem [shape: bf16[32,64], index: 2, kind: input, shape index: {}]   ;;  %s2530_s3 = inlined_call_operand.vmem [shape: f32[1,64], index: 3, kind: input, shape index: {}]   ;;  %s2531_s4 = inlined_call_operand.vmem [shape: f32[64,32], index: 4, kind: input, shape index: {}]   ;;  %s2532_s5 = inlined_call_operand.vmem [shape: f32[1,32], index: 5, kind: input, shape index: {}]   ;;  %s2533_s6 = inlined_call_operand.vmem [shape: f32[2,16], index: 6, kind: input, shape index: {}]   ;;  %s2534_s7 = inlined_call_operand.vmem [shape: f32[2,1], index: 7, kind: input, shape index: {}]   ;;  %s2535_s8 = inlined_call_operand.vmem [shape: f32[1,3], index: 8, kind: input, shape index: {}]   ;;  %s2536_s9 = inlined_call_operand.vmem [shape: f32[3,32], index: 9, kind: input, shape index: {}]   ;;  %s2537_s10 = inlined_call_operand.vmem [shape: f32[1,32], index: 10, kind: input, shape index: {}]   ;;  %s2538_s11 = inlined_call_operand.vmem [shape: f32[32,64], index: 11, kind: input, shape index: {}]   ;;  %s2539_s12 = inlined_call_operand.vmem [shape: f32[1,64], index: 12, kind: input, shape index: {}]   ;;  %s2540_s13 = inlined_call_operand.vmem [shape: f32[64,32], index: 13, kind: input, shape index: {}]   ;;  %s2541_s14 = inlined_call_operand.vmem [shape: f32[1,32], index: 14, kind: input, shape index: {}]   ;;  %s2542_s15 = inlined_call_operand.vmem [shape: f32[32,32], index: 15, kind: input, shape index: {}]   ;;  %s2543_s16 = inlined_call_operand.vmem [shape: f32[1,32], index: 16, kind: input, shape index: {}]   ;;  %s2544_s17 = inlined_call_operand.vmem [shape: f32[2,32], index: 17, kind: input, shape index: {}]   ;;  %s2545_s18 = inlined_call_operand.vmem [shape: f32[1,2], index: 18, kind: input, shape index: {}]   ;;  %s2546_s19 = inlined_call_operand.vmem [shape: f32[1,2], index: 19, kind: output, shape index: {0}]   ;;  %s2547_s20 = inlined_call_operand.hbm [shape: f32[1,2], index: 20, kind: output, shape index: {1}]   ;;  %s2548_s21 = inlined_call_operand.hbm [shape: f32[2,128], index: 21, kind: output, shape index: {2}]  }
   0x1   :  { %2552 = sst [smem:[#allocation13_spill]] %s2527_s0 }
   0x2   :  { %2553 = sst [smem:[#allocation14_spill]] %s2528_s1 }
   0x3   :  { %2554 = sst [smem:[#allocation15_spill]] %s2529_s2 }
   0x4   :  { %2555 = sst [smem:[#allocation16_spill]] %s2530_s3 }
   0x5   :  { %2556 = sst [smem:[#allocation17_spill]] %s2531_s4 }
   0x6   :  { %2557 = sst [smem:[#allocation18_spill]] %s2532_s5 }
   0x7   :  { %28 = vsyncpa [#allocation8], 0  ;;  %s2558_s26 = sld [smem:[#allocation15_spill]]  ;;  %vm155_vm0 = vcmask 261120   ;;  %s2559_s0 = sld [smem:[#allocation14_spill]] }
   0x8   :  { %s2560_s24 = sld [smem:[#allocation17_spill]] }
   0xd   :  { %v1852_v0 = vld [vmem:[%s2558_s26] sm:$0xff]   ;;  %v1853_v1 = vld [vmem:[%s2558_s26 + $0x8] sm:$0xff]   ;;  %v1856_v4 = vld [vmem:[%s2559_s0 + $0x10] sm:$0xff]  }
   0xe   :  { %1570 = vmatprep.subr.bf16.mxu0 %v1852_v0  ;;  %v1854_v2 = vld [vmem:[%s2559_s0] sm:$0xff]   ;;  %v1855_v3 = vld [vmem:[%s2559_s0 + $0x8] sm:$0xff]   ;;  %v295_v7 = vld [vmem:[%s2560_s24 + $0x10] sm:$0xff] }
   0xf   :  { %1571 = vmatpush3.bf16.msra.mxu0 %v1852_v0  ;;  %1574 = vmatprep.mubr.msk.bf16.mxu0 %vm155_vm0, %v1854_v2  ;;  %v293_v5 = vld [vmem:[%s2560_s24] sm:$0xff]  ;;  %v294_v6 = vld [vmem:[%s2560_s24 + $0x8] sm:$0xff]  ;;  %v296_v9 = vld [vmem:[%s2560_s24 + $0x18] sm:$0xff] }
  0x10   :  { %1572 = vmatprep.subr.bf16.mxu0 %v1853_v1  ;;  %v1746_v8 = vpack.c.bf16 %v294_v6, %v293_v5 }
  0x13   :  { %1573 = vmatpush3.bf16.msra.mxu0 %v1853_v1 }
  0x16   :  { %1575 = vmatmul.mubr.msk.bf16.vlgmr.msra.gmra.mrb[0].mxu0 %vm155_vm0, %v1855_v3 }
  0x17   :  { %1578 = vmatprep.mubr.msk.bf16.mxu0 %vm155_vm0, %v1856_v4 }
  0x18   :  { %29 = vsyncpa [#allocation10], 0  ;;  %v1750_v10 = vpack.c.bf16 %v296_v9, %v295_v7  ;;  %1747 = vmatprep.subr.bf16.mxu1 %v1746_v8  ;;  %v1857_v11 = vld [vmem:[%s2559_s0 + $0x18] sm:$0xff]   ;;  %v1858_v12 = vld [vmem:[%s2559_s0 + $0x20] sm:$0xff]   ;;  %v2020_v22 = vmov 0.0|0.0   ;;  %s2561_s1 = sld [smem:[#allocation16_spill]] }
  0x19   :  { %1749 = vmatpush3.bf16.msra.mxu1 %v1746_v8  ;;  %v1859_v13 = vld [vmem:[%s2559_s0 + $0x28] sm:$0xff]   ;;  %v1860_v14 = vld [vmem:[%s2559_s0 + $0x30] sm:$0xff]   ;;  %v1861_v15 = vld [vmem:[%s2559_s0 + $0x38] sm:$0xff]   ;;  %1762 = vmatprep.subr.bf16.mxu0 %v2020_v22  ;;  %vm308_vm1 = vcmask 523264   ;;  %s2562_s25 = sld [smem:[#allocation18_spill]]  ;;  %s2021_s26 = smov 112  }
  0x1a   :  { %1751 = vmatprep.subr.bf16.mxu1 %v1750_v10  ;;  %v297_v16 = vld [vmem:[%s2560_s24 + $0x20] sm:$0xff]  ;;  %v298_v17 = vld [vmem:[%s2560_s24 + $0x28] sm:$0xff]  ;;  %v299_v19 = vld [vmem:[%s2560_s24 + $0x30] sm:$0xff]  ;;  %vm2022_vm2 = vmmov 0   ;;  %vm701_vm3 = vcmask 130048   ;;  %s2565_s30 = sld [smem:[#allocation13_spill]] }
  0x1b   :  { %v1754_v18 = vpack.c.bf16 %v298_v17, %v297_v16  ;;  %v300_v20 = vld [vmem:[%s2560_s24 + $0x38] sm:$0xff]  ;;  %vm2349_vm4 = vmpackc.low %vm701_vm3, %vm701_vm3  ;;  %vm834_vm6 = vcmask 1041408   ;;  %vm71_vm7 = vcmask 1024   ;;  %vm74_vm8 = vcmask 517120  }
  0x1c   :  { %v1758_v21 = vpack.c.bf16 %v300_v20, %v299_v19  ;;  %vm972_vm9 = vcmask 1042432   ;;  %vm968_vm10 = vcmask 23552   ;;  %vm1126_vm11 = vcmask 516096  }
  0x1d   :  { %1753 = vmatpush3.bf16.msra.mxu1 %v1750_v10  ;;  %vm1321_vm12 = vcmask 254976   ;;  %vm1359_vm13 = vcmask 8192  }
  0x1e   :  { %1579 = vmatmul.mubr.msk.bf16.gmra.mrb[4].mxu0 %vm155_vm0, %v1857_v11  ;;  %1755 = vmatprep.subr.bf16.mxu1 %v1754_v18  ;;  %v2205_v23 = vld [vmem:[%s2561_s1] ss:$0 sm:$0xff] }
  0x1f   :  { %1582 = vmatprep.mubr.msk.bf16.mxu0 %vm155_vm0, %v1858_v12  ;;  %v2249_v16 = vld [vmem:[%s2562_s25] ss:$0 sm:$0xff] }
  0x21   :  { %1757 = vmatpush3.bf16.msra.mxu1 %v1754_v18 }
  0x22   :  { %1759 = vmatprep.subr.bf16.mxu1 %v1758_v21 }
  0x25   :  { %1761 = vmatpush3.bf16.msra.mxu1 %v1758_v21 }
  0x26   :  { %1583 = vmatmul.mubr.msk.bf16.gmra.mrb[8].mxu0 %vm155_vm0, %v1859_v13  ;;  %1794 = vmatprep.subr.bf16.mxu1 %v2020_v22 }
  0x27   :  { %1586 = vmatprep.mubr.msk.bf16.mxu0 %vm155_vm0, %v1860_v14 }
  0x2e   :  { %1587 = vmatmul.mubr.msk.bf16.gmra.mrb[12].mxu0 %vm155_vm0, %v1861_v15 }
  0xe9   :  { %v1576_v24 = vpop.f32.mrb[0].mxu0 }
  0xea   :  { %v223_v25 = vadd.f32 %v1576_v24, %v2205_v23  ;;  %v214_v26 = vpop.f32.mrb[1].mxu0 }
  0xeb   :  { %v215_v27 = vadd.f32 %v2205_v23, %v214_v26  ;;  %v1577_v28 = vpop.f32.mrb[2].mxu0 }
  0xec   :  { %v226_v29 = vadd.f32 %v1577_v28, %v2205_v23  ;;  %v217_v30 = vpop.f32.mrb[3].mxu0  ;;  %v279_v33 = vmax.f32 %v223_v25, 0.0 }
  0xed   :  { %v277_v31 = vmax.f32 %v215_v27, 0.0  ;;  %v218_v32 = vadd.f32 %v2205_v23, %v217_v30 }
  0xee   :  { %v280_v34 = vmax.f32 %v226_v29, 0.0 }
  0xef   :  { %v278_v35 = vmax.f32 %v218_v32, 0.0  ;;  %1606 = vmatprep.mubr.msk.f32.mxu1 %vm308_vm1, %v277_v31 }
  0xf0   :  { %v1798_v36 = vpack.c.bf16 %v280_v34, %v279_v33 }
  0xf1   :  { %v1795_v37 = vpack.c.bf16 %v278_v35, %v277_v31  ;;  %v1580_v38 = vpop.f32.mrb[4].mxu0  ;;  %1607 = vmatmul.mubr.msk.f32.vlgmr.msra.gmra.mrb[0].mxu1 %vm308_vm1, %v278_v35 }
  0xf2   :  { %v239_v39 = vadd.f32 %v1580_v38, %v2205_v23  ;;  %v230_v40 = vpop.f32.mrb[5].mxu0  ;;  %1609 = vmatprep.mubr.msk.f32.mxu1 %vm308_vm1, %v279_v33 }
  0xf3   :  { %v231_v41 = vadd.f32 %v2205_v23, %v230_v40  ;;  %v1581_v42 = vpop.f32.mrb[6].mxu0  ;;  %1796 = vmatpush3.bf16.msra.mxu1 %v1795_v37 }
  0xf4   :  { %v242_v43 = vadd.f32 %v1581_v42, %v2205_v23  ;;  %v233_v44 = vpop.f32.mrb[7].mxu0  ;;  %1797 = vmatprep.subr.bf16.mxu1 %v2020_v22  ;;  %v283_v47 = vmax.f32 %v239_v39, 0.0 }
  0xf5   :  { %v281_v45 = vmax.f32 %v231_v41, 0.0  ;;  %v234_v46 = vadd.f32 %v2205_v23, %v233_v44  ;;  %1610 = vmatmul.mubr.msk.f32.gmra.mrb[2].mxu1 %vm308_vm1, %v280_v34 }
  0xf6   :  { %v284_v48 = vmax.f32 %v242_v43, 0.0 }
  0xf7   :  { %v282_v49 = vmax.f32 %v234_v46, 0.0  ;;  %1799 = vmatpush3.bf16.msra.mxu1 %v1798_v36  ;;  %1612 = vmatprep.mubr.msk.f32.mxu1 %vm308_vm1, %v281_v45 }
  0xf8   :  { %v1804_v50 = vpack.c.bf16 %v284_v48, %v283_v47  ;;  %1800 = vmatprep.subr.bf16.mxu1 %v2020_v22 }
  0xf9   :  { %v1801_v51 = vpack.c.bf16 %v282_v49, %v281_v45  ;;  %v1584_v52 = vpop.f32.mrb[8].mxu0  ;;  %1613 = vmatmul.mubr.msk.f32.gmra.mrb[4].mxu1 %vm308_vm1, %v282_v49 }
  0xfa   :  { %v255_v53 = vadd.f32 %v1584_v52, %v2205_v23  ;;  %v246_v54 = vpop.f32.mrb[9].mxu0  ;;  %1615 = vmatprep.mubr.msk.f32.mxu1 %vm308_vm1, %v283_v47 }
  0xfb   :  { %v247_v55 = vadd.f32 %v2205_v23, %v246_v54  ;;  %v1585_v56 = vpop.f32.mrb[10].mxu0  ;;  %1802 = vmatpush3.bf16.msra.mxu1 %v1801_v51 }
  0xfc   :  { %v258_v57 = vadd.f32 %v1585_v56, %v2205_v23  ;;  %v249_v58 = vpop.f32.mrb[11].mxu0  ;;  %1803 = vmatprep.subr.bf16.mxu1 %v2020_v22  ;;  %v287_v61 = vmax.f32 %v255_v53, 0.0 }
  0xfd   :  { %v285_v59 = vmax.f32 %v247_v55, 0.0  ;;  %v250_v60 = vadd.f32 %v2205_v23, %v249_v58  ;;  %1616 = vmatmul.mubr.msk.f32.gmra.mrb[6].mxu1 %vm308_vm1, %v284_v48 }
  0xfe   :  { %v288_v62 = vmax.f32 %v258_v57, 0.0 }
  0xff   :  { %v286_v63 = vmax.f32 %v250_v60, 0.0  ;;  %1618 = vmatprep.mubr.msk.f32.mxu1 %vm308_vm1, %v285_v59  ;;  %1805 = vmatpush3.bf16.msra.mxu1 %v1804_v50 }
 0x100   :  { %v1810_v0 = vpack.c.bf16 %v288_v62, %v287_v61  ;;  %1806 = vmatprep.subr.bf16.mxu1 %v2020_v22 }
 0x101   :  { %v1807_v1 = vpack.c.bf16 %v286_v63, %v285_v59  ;;  %v1588_v2 = vpop.f32.mrb[12].mxu0  ;;  %1619 = vmatmul.mubr.msk.f32.gmra.mrb[8].mxu1 %vm308_vm1, %v286_v63 }
 0x102   :  { %v271_v3 = vadd.f32 %v1588_v2, %v2205_v23  ;;  %v262_v4 = vpop.f32.mrb[13].mxu0  ;;  %1621 = vmatprep.mubr.msk.f32.mxu1 %vm308_vm1, %v287_v61 }
 0x103   :  { %v263_v5 = vadd.f32 %v2205_v23, %v262_v4  ;;  %v1589_v6 = vpop.f32.mrb[14].mxu0  ;;  %1808 = vmatpush3.bf16.msra.mxu1 %v1807_v1 }
 0x104   :  { %v274_v7 = vadd.f32 %v1589_v6, %v2205_v23  ;;  %v265_v8 = vpop.f32.mrb[15].mxu0  ;;  %1809 = vmatprep.subr.bf16.mxu1 %v2020_v22  ;;  %v291_v11 = vmax.f32 %v271_v3, 0.0 }
 0x105   :  { %v289_v9 = vmax.f32 %v263_v5, 0.0  ;;  %v266_v10 = vadd.f32 %v2205_v23, %v265_v8  ;;  %1622 = vmatmul.mubr.msk.f32.gmra.mrb[10].mxu1 %vm308_vm1, %v288_v62 }
 0x106   :  { %v292_v12 = vmax.f32 %v274_v7, 0.0 }
 0x107   :  { %v290_v13 = vmax.f32 %v266_v10, 0.0  ;;  %1624 = vmatprep.mubr.msk.f32.mxu1 %vm308_vm1, %v289_v9  ;;  %1811 = vmatpush3.bf16.msra.mxu1 %v1810_v0 }
 0x108   :  { %v1816_v14 = vpack.c.bf16 %v292_v12, %v291_v11  ;;  %1812 = vmatprep.subr.bf16.mxu1 %v2020_v22 }
 0x109   :  { %v1813_v15 = vpack.c.bf16 %v290_v13, %v289_v9  ;;  %1625 = vmatmul.mubr.msk.f32.gmra.mrb[12].mxu1 %vm308_vm1, %v290_v13 }
 0x10a   :  { %1627 = vmatprep.mubr.msk.f32.mxu1 %vm308_vm1, %v291_v11 }
 0x10b   :  { %1814 = vmatpush3.bf16.msra.mxu1 %v1813_v15 }
 0x10c   :  { %1815 = vmatprep.subr.bf16.mxu1 %v2020_v22 }
 0x10d   :  { %1628 = vmatmul.mubr.msk.f32.gmra.mrb[14].mxu1 %vm308_vm1, %v292_v12 }
 0x10f   :  { %1817 = vmatpush3.bf16.msra.mxu1 %v1816_v14 }
 0x1c4   :  { %v1608_v17 = vpop.f32.mrb[0].mxu1 }
 0x1c5   :  { %v2252_v18 = vadd.f32 %v1608_v17, %v2249_v16  ;;  %v423_v19 = vpop.f32.mrb[1].mxu1 }
 0x1c6   :  { %v2255_v20 = vadd.f32 %v2249_v16, %v423_v19 }
 0x1c7   :  { %v1442_v21 = vmul.f32 -1.442695, %v2252_v18 }
 0x1c8   :  { %v1441_v23 = vmul.f32 -1.442695, %v2255_v20  ;;  %v1611_v24 = vpop.f32.mrb[2].mxu1 }
 0x1c9   :  { %1862 = vpow2.f32 %v1442_v21  ;;  %v2260_v25 = vadd.f32 %v1611_v24, %v2249_v16  ;;  %v433_v26 = vpop.f32.mrb[3].mxu1 }
 0x1ca   :  { %1864 = vpow2.f32 %v1441_v23  ;;  %v2263_v27 = vadd.f32 %v2249_v16, %v433_v26 }
 0x1cb   :  { %v1444_v28 = vmul.f32 -1.442695, %v2260_v25 }
 0x1cc   :  { %v1443_v29 = vmul.f32 -1.442695, %v2263_v27  ;;  %v1614_v30 = vpop.f32.mrb[4].mxu1 }
 0x1cd   :  { %1866 = vpow2.f32 %v1444_v28  ;;  %v2268_v31 = vadd.f32 %v1614_v30, %v2249_v16  ;;  %v443_v32 = vpop.f32.mrb[5].mxu1 }
 0x1ce   :  { %1868 = vpow2.f32 %v1443_v29  ;;  %v2271_v33 = vadd.f32 %v2249_v16, %v443_v32 }
 0x1cf   :  { %v1446_v34 = vmul.f32 -1.442695, %v2268_v31 }
 0x1d0   :  { %v1445_v35 = vmul.f32 -1.442695, %v2271_v33  ;;  %v1617_v36 = vpop.f32.mrb[6].mxu1 }
 0x1d1   :  { %1870 = vpow2.f32 %v1446_v34  ;;  %v2276_v37 = vadd.f32 %v1617_v36, %v2249_v16  ;;  %v453_v38 = vpop.f32.mrb[7].mxu1 }
 0x1d2   :  { %1872 = vpow2.f32 %v1445_v35  ;;  %v2279_v39 = vadd.f32 %v2249_v16, %v453_v38 }
 0x1d3   :  { %v1863_v40 = vpop.eup %1862  ;;  %v1448_v41 = vmul.f32 -1.442695, %v2276_v37 }
 0x1d4   :  { %v1865_v42 = vpop.eup %1864  ;;  %v1447_v43 = vmul.f32 -1.442695, %v2279_v39  ;;  %v1620_v44 = vpop.f32.mrb[8].mxu1  ;;  %v567_v48 = vadd.f32 1.0, %v1863_v40 }
 0x1d5   :  { %v566_v45 = vadd.f32 1.0, %v1865_v42  ;;  %1874 = vpow2.f32 %v1448_v41  ;;  %v2284_v46 = vadd.f32 %v1620_v44, %v2249_v16  ;;  %v463_v47 = vpop.f32.mrb[9].mxu1 }
 0x1d6   :  { %v2288_v52 = vadd.f32 %v2249_v16, %v463_v47 }
 0x1d7   :  { %v1867_v49 = vpop.eup %1866  ;;  %1876 = vrcp.f32 %v566_v45  ;;  %v1450_v51 = vmul.f32 -1.442695, %v2284_v46 }
 0x1d8   :  { %v1869_v50 = vpop.eup %1868  ;;  %1878 = vpow2.f32 %v1447_v43  ;;  %v1623_v53 = vpop.f32.mrb[10].mxu1  ;;  %v569_v56 = vadd.f32 1.0, %v1867_v49  ;;  %v1449_v60 = vmul.f32 -1.442695, %v2288_v52 }
 0x1d9   :  { %v568_v54 = vadd.f32 1.0, %v1869_v50  ;;  %v473_v55 = vpop.f32.mrb[11].mxu1  ;;  %1880 = vrcp.f32 %v567_v48  ;;  %v2291_v58 = vadd.f32 %v1623_v53, %v2249_v16 }
 0x1da   :  { %v2295_v1 = vadd.f32 %v2249_v16, %v473_v55 }
 0x1db   :  { %v1871_v57 = vpop.eup %1870  ;;  %1882 = vrcp.f32 %v568_v54  ;;  %v1452_v3 = vmul.f32 -1.442695, %v2291_v58 }
 0x1dc   :  { %v1873_v59 = vpop.eup %1872  ;;  %1884 = vpow2.f32 %v1450_v51  ;;  %v1626_v61 = vpop.f32.mrb[12].mxu1  ;;  %v571_v62 = vadd.f32 1.0, %v1871_v57  ;;  %v1451_v10 = vmul.f32 -1.442695, %v2295_v1 }
 0x1dd   :  { %v570_v63 = vadd.f32 1.0, %v1873_v59  ;;  %v483_v0 = vpop.f32.mrb[13].mxu1  ;;  %1886 = vrcp.f32 %v569_v56  ;;  %v2299_v5 = vadd.f32 %v1626_v61, %v2249_v16 }
 0x1de   :  { %v2304_v12 = vadd.f32 %v2249_v16, %v483_v0  ;;  %v2024_v0 = vmov 0  }
 0x1df   :  { %v1875_v2 = vpop.eup %1874  ;;  %1888 = vrcp.f32 %v570_v63  ;;  %v1454_v14 = vmul.f32 -1.442695, %v2299_v5  ;;  %v695_v63 = vld [vmem:[%s2534_s7] sm:$0x3]  ;;  %1850 = vset.pattern.permute.xlu0 %v2024_v0  ;;  %1851 = vset.pattern.permute.xlu1 %v2024_v0 }
 0x1e0   :  { %v573_v4 = vadd.f32 1.0, %v1875_v2  ;;  %1890 = vpow2.f32 %v1449_v60  ;;  %v1629_v6 = vpop.f32.mrb[14].mxu1  ;;  %v1453_v23 = vmul.f32 -1.442695, %v2304_v12 }
 0x1e1   :  { %v1877_v7 = vpop.eup %1876  ;;  %1892 = vrcp.f32 %v571_v62  ;;  %v493_v8 = vpop.f32.mrb[15].mxu1  ;;  %v2308_v19 = vadd.f32 %v1629_v6, %v2249_v16  ;;  %v2023_v62 = vmov 0.0  }
 0x1e2   :  { %v1879_v9 = vpop.eup %1878  ;;  %630 = vrot.lane.b32.xlu0 %v1877_v7, %s2021_s26  ;;  %1894 = vpow2.f32 %v1452_v3  ;;  %v2314_v28 = vadd.f32 %v2249_v16, %v493_v8  ;;  %1662 = vmatprep.mubr.msk.f32.mxu0 %vm2022_vm2, %v2023_v62  ;;  %73 = vst.msk [vmem:[#allocation3] sm:$0x3] %vm71_vm7, %v2023_v62 }
 0x1e3   :  { %v572_v11 = vadd.f32 1.0, %v1879_v9  ;;  %v1881_v13 = vpop.eup %1880  ;;  %1896 = vrcp.f32 %v573_v4  ;;  %v1456_v30 = vmul.f32 -1.442695, %v2308_v19  ;;  %1697 = vmatprep.mubr.msk.f32.mxu1 %vm2022_vm2, %v2023_v62  ;;  %1700 = vmatprep.subr.mxu1 %v2023_v62  ;;  %75 = vst.msk [vmem:[#allocation4] sm:$0x3] %vm74_vm8, %v2023_v62 }
 0x1e4   :  { %v1455_v36 = vmul.f32 -1.442695, %v2314_v28 }
 0x1e5   :  { %v1883_v15 = vpop.eup %1882  ;;  %1898 = vrcp.f32 %v572_v11 }
 0x1e6   :  { %v1885_v17 = vpop.eup %1884  ;;  %1900 = vpow2.f32 %v1451_v10  ;;  %634 = vrot.lane.b32.xlu1 %v1883_v15, %s2021_s26  ;;  %632 = vrot.lane.b32.xlu0 %v1881_v13, %s2021_s26 }
 0x1e7   :  { %v575_v21 = vadd.f32 1.0, %v1885_v17  ;;  %v1887_v24 = vpop.eup %1886  ;;  %1902 = vpow2.f32 %v1454_v14 }
 0x1e9   :  { %v1889_v26 = vpop.eup %1888  ;;  %1904 = vrcp.f32 %v575_v21 }
 0x1ea   :  { %v1891_v29 = vpop.eup %1890  ;;  %636 = vrot.lane.b32.xlu1 %v1887_v24, %s2021_s26  ;;  %638 = vrot.lane.b32.xlu0 %v1889_v26, %s2021_s26  ;;  %1906 = vpow2.f32 %v1453_v23 }
 0x1eb   :  { %v1893_v32 = vpop.eup %1892  ;;  %v574_v34 = vadd.f32 1.0, %v1891_v29 }
 0x1ec   :  { %v1895_v35 = vpop.eup %1894 }
 0x1ed   :  { %1908 = vrcp.f32 %v574_v34  ;;  %v1897_v38 = vpop.eup %1896  ;;  %v577_v40 = vadd.f32 1.0, %v1895_v35 }
 0x1ee   :  { %1910 = vpow2.f32 %v1456_v30  ;;  %640 = vrot.lane.b32.xlu1 %v1893_v32, %s2021_s26 }
 0x1ef   :  { %v1899_v16 = vpop.eup %1898  ;;  %1912 = vrcp.f32 %v577_v40 }
 0x1f0   :  { %v1901_v41 = vpop.eup %1900  ;;  %642 = vrot.lane.b32.xlu0 %v1899_v16, %s2021_s26  ;;  %1914 = vpow2.f32 %v1455_v36 }
 0x1f1   :  { %v576_v42 = vadd.f32 1.0, %v1901_v41  ;;  %v1903_v43 = vpop.eup %1902 }
 0x1f2   :  { %644 = vrot.lane.b32.xlu1 %v1897_v38, %s2021_s26  ;;  %v579_v45 = vadd.f32 1.0, %v1903_v43 }
 0x1f3   :  { %v1905_v44 = vpop.eup %1904  ;;  %1916 = vrcp.f32 %v576_v42 }
 0x1f4   :  { %v1907_v47 = vpop.eup %1906  ;;  %1918 = vrcp.f32 %v579_v45 }
 0x1f5   :  { %v578_v48 = vadd.f32 1.0, %v1907_v47 }
 0x1f6   :  { %648 = vrot.lane.b32.xlu1 %v1905_v44, %s2021_s26 }
 0x1f7   :  { %v1909_v49 = vpop.eup %1908  ;;  %1920 = vrcp.f32 %v578_v48 }
 0x1f8   :  { %v1911_v50 = vpop.eup %1910  ;;  %646 = vrot.lane.b32.xlu0 %v1909_v49, %s2021_s26 }
 0x1f9   :  { %v581_v51 = vadd.f32 1.0, %v1911_v50  ;;  %v1913_v53 = vpop.eup %1912 }
 0x1fa   :  { %v1915_v54 = vpop.eup %1914  ;;  %652 = vrot.lane.b32.xlu1 %v1913_v53, %s2021_s26 }
 0x1fb   :  { %1922 = vrcp.f32 %v581_v51  ;;  %v580_v55 = vadd.f32 1.0, %v1915_v54 }
 0x1fd   :  { %v1917_v56 = vpop.eup %1916  ;;  %1924 = vrcp.f32 %v580_v55 }
 0x1fe   :  { %650 = vrot.lane.b32.xlu0 %v1917_v56, %s2021_s26  ;;  %v1919_v57 = vpop.eup %1918  ;;  %1926 = vtanh.f32 %v2252_v18 }
 0x1ff   :  { %656 = vrot.lane.b32.xlu1 %v1919_v57, %s2021_s26  ;;  %1928 = vtanh.f32 %v2255_v20 }
 0x200   :  { %1930 = vtanh.f32 %v2260_v25 }
 0x201   :  { %v1921_v59 = vpop.eup %1920  ;;  %1932 = vtanh.f32 %v2263_v27 }
 0x202   :  { %654 = vrot.lane.b32.xlu0 %v1921_v59, %s2021_s26  ;;  %1934 = vtanh.f32 %v2268_v31  ;;  %v694_v59 = vld [vmem:[%s2533_s6] sm:$0x3] }
 0x203   :  { %1936 = vtanh.f32 %v2271_v33 }
 0x204   :  { %1938 = vtanh.f32 %v2276_v37 }
 0x205   :  { %v1923_v60 = vpop.eup %1922  ;;  %1940 = vtanh.f32 %v2279_v39 }
 0x206   :  { %660 = vrot.lane.b32.xlu1 %v1923_v60, %s2021_s26  ;;  %1942 = vtanh.f32 %v2284_v46  ;;  %v824_v60 = vlaneseq }
 0x207   :  { %v1925_v61 = vpop.eup %1924  ;;  %1944 = vtanh.f32 %v2288_v52 }
 0x208   :  { %658 = vrot.lane.b32.xlu0 %v1925_v61, %s2021_s26  ;;  %v1927_v3 = vpop.eup %1926  ;;  %1946 = vtanh.f32 %v2291_v58  ;;  %v825_v61 = vand.u32 127, %v824_v60 }
 0x209   :  { %v1929_v4 = vpop.eup %1928  ;;  %1948 = vtanh.f32 %v2295_v1 }
 0x20a   :  { %v1931_v25 = vpop.eup %1930  ;;  %1950 = vtanh.f32 %v2299_v5 }
 0x20b   :  { %v1933_v31 = vpop.eup %1932  ;;  %1952 = vtanh.f32 %v2304_v12 }
 0x20c   :  { %698 = vperm.xlu0 %1850, %v695_v63   ;;  %v1935_v37 = vpop.eup %1934  ;;  %1954 = vtanh.f32 %v2308_v19  ;;  %v830_v63 = vstv %s2565_s30 }
 0x20d   :  { %v1937_v13 = vpop.eup %1936  ;;  %1956 = vtanh.f32 %v2314_v28  ;;  %vm831_vm5 = vcmp.lt.s32.totalorder %v825_v61, %v830_v63 }
 0x20e   :  { %v1939_v23 = vpop.eup %1938 }
 0x20f   :  { %v1941_v26 = vpop.eup %1940 }
 0x210   :  { %v1943_v52 = vpop.eup %1942 }
 0x211   :  { %v1945_v36 = vpop.eup %1944 }
 0x212   :  { %v1947_v41 = vpop.eup %1946 }
 0x213   :  { %v1949_v42 = vpop.eup %1948 }
 0x214   :  { %v1951_v45 = vpop.eup %1950 }
 0x215   :  { %v1953_v48 = vpop.eup %1952 }
 0x216   :  { %v1955_v53 = vpop.eup %1954 }
 0x217   :  { %v1957_v55 = vpop.eup %1956 }
 0x254   :  { %v631_v2 = vpop.permute.xlu0 %630 }
 0x255   :  { %v678_v8 = vmul.f32 %v1929_v4, %v631_v2 }
 0x258   :  { %v635_v6 = vpop.permute.xlu1 %634  ;;  %v633_v7 = vpop.permute.xlu0 %632 }
 0x259   :  { %v679_v18 = vmul.f32 %v1927_v3, %v633_v7  ;;  %v680_v10 = vmul.f32 %v1933_v31, %v635_v6 }
 0x25b   :  { %v1763_v27 = vpack.c.bf16 %v679_v18, %v678_v8  ;;  %v2025_v8 = vmov -1e+30  }
 0x25c   :  { %v637_v33 = vpop.permute.xlu1 %636  ;;  %v639_v9 = vpop.permute.xlu0 %638  ;;  %72 = vst.msk [vmem:[#allocation2] sm:$0x3] %vm71_vm7, %v2025_v8 }
 0x25d   :  { %v681_v11 = vmul.f32 %v1931_v25, %v637_v33  ;;  %1765 = vmatpush3.bf16.xpose.msk.msra.mxu0 %vm2349_vm4, %v1763_v27  ;;  %v682_v15 = vmul.f32 %v1937_v13, %v639_v9 }
 0x25e   :  { %1766 = vmatprep.subr.bf16.mxu0 %v2020_v22 }
 0x25f   :  { %v1767_v39 = vpack.c.bf16 %v681_v11, %v680_v10 }
 0x260   :  { %v641_v14 = vpop.permute.xlu1 %640 }
 0x261   :  { %v683_v17 = vmul.f32 %v1935_v37, %v641_v14  ;;  %v966_v37 = vld [vmem:[%s2536_s9] sm:$0x7] }
 0x262   :  { %v643_v21 = vpop.permute.xlu0 %642  ;;  %v965_v14 = vld [vmem:[%s2535_s8] sm:$0x1] }
 0x263   :  { %v1771_v24 = vpack.c.bf16 %v683_v17, %v682_v15  ;;  %v684_v30 = vmul.f32 %v1941_v26, %v643_v21  ;;  %v833_v18 = vld [vmem:[#allocation2] sm:$0x3]  ;;  %v1048_v17 = vld [vmem:[%s2538_s11 + $0x8] sm:$0xff] }
 0x264   :  { %v645_v29 = vpop.permute.xlu1 %644  ;;  %v1047_v15 = vld [vmem:[%s2538_s11] sm:$0xff] }
 0x265   :  { %v685_v32 = vmul.f32 %v1939_v23, %v645_v29  ;;  %1769 = vmatpush3.bf16.xpose.msk.msra.mxu0 %vm2349_vm4, %v1767_v39  ;;  %v1819_v21 = vpack.c.bf16 %v1048_v17, %v1047_v15  ;;  %v1049_v23 = vld [vmem:[%s2538_s11 + $0x10] sm:$0xff]  ;;  %v850_v29 = vld [vmem:[#allocation3] sm:$0x3] }
 0x266   :  { %1770 = vmatprep.subr.bf16.mxu0 %v2020_v22 }
 0x267   :  { %v1775_v46 = vpack.c.bf16 %v685_v32, %v684_v30 }
 0x268   :  { %v649_v34 = vpop.permute.xlu1 %648 }
 0x269   :  { %v687_v35 = vmul.f32 %v1943_v52, %v649_v34 }
 0x26a   :  { %v647_v38 = vpop.permute.xlu0 %646 }
 0x26b   :  { %v686_v58 = vmul.f32 %v1945_v36, %v647_v38 }
 0x26c   :  { %v653_v16 = vpop.permute.xlu1 %652 }
 0x26d   :  { %v1779_v40 = vpack.c.bf16 %v687_v35, %v686_v58  ;;  %1773 = vmatpush3.bf16.xpose.msk.msra.mxu0 %vm2349_vm4, %v1771_v24  ;;  %v689_v1 = vmul.f32 %v1947_v41, %v653_v16  ;;  %v1050_v24 = vld [vmem:[%s2538_s11 + $0x18] sm:$0xff]  ;;  %v858_v35 = vld [vmem:[#allocation4] sm:$0x3]  ;;  %v967_v41 = vld [vmem:[%s2537_s10] sm:$0x1] }
 0x26e   :  { %1774 = vmatprep.subr.bf16.mxu0 %v2020_v22  ;;  %v1822_v26 = vpack.c.bf16 %v1050_v24, %v1049_v23 }
 0x270   :  { %v651_v43 = vpop.permute.xlu0 %650 }
 0x271   :  { %v688_v5 = vmul.f32 %v1949_v42, %v651_v43  ;;  %v657_v44 = vpop.permute.xlu1 %656 }
 0x272   :  { %v691_v47 = vmul.f32 %v1951_v45, %v657_v44 }
 0x273   :  { %v1783_v12 = vpack.c.bf16 %v689_v1, %v688_v5 }
 0x274   :  { %v655_v49 = vpop.permute.xlu0 %654 }
 0x275   :  { %1777 = vmatpush3.bf16.xpose.msk.msra.mxu0 %vm2349_vm4, %v1775_v46  ;;  %v690_v50 = vmul.f32 %v1953_v48, %v655_v49  ;;  %v1051_v48 = vld [vmem:[%s2539_s12] sm:$0x1] }
 0x276   :  { %1778 = vmatprep.subr.bf16.mxu0 %v2020_v22 }
 0x277   :  { %v1787_v51 = vpack.c.bf16 %v691_v47, %v690_v50 }
 0x278   :  { %v661_v19 = vpop.permute.xlu1 %660 }
 0x279   :  { %v693_v54 = vmul.f32 %v1955_v53, %v661_v19 }
 0x27a   :  { %v659_v56 = vpop.permute.xlu0 %658 }
 0x27b   :  { %v692_v28 = vmul.f32 %v1957_v55, %v659_v56 }
 0x27d   :  { %1781 = vmatpush3.bf16.xpose.msk.msra.mxu0 %vm2349_vm4, %v1779_v40  ;;  %v1791_v57 = vpack.c.bf16 %v693_v54, %v692_v28 }
 0x27e   :  { %1782 = vmatprep.subr.bf16.mxu0 %v2020_v22 }
 0x285   :  { %1785 = vmatpush3.bf16.xpose.msk.msra.mxu0 %vm2349_vm4, %v1783_v12 }
 0x286   :  { %1786 = vmatprep.subr.bf16.mxu0 %v2020_v22 }
 0x28b   :  { %v699_v0 = vpop.permute.xlu0 %698 }
 0x28d   :  { %1789 = vmatpush3.bf16.xpose.msk.msra.mxu0 %vm2349_vm4, %v1787_v51 }
 0x28e   :  { %1790 = vmatprep.subr.bf16.mxu0 %v2020_v22 }
 0x295   :  { %1793 = vmatpush3.bf16.xpose.msk.msra.mxu0 %vm2349_vm4, %v1791_v57 }
 0x296   :  { %1836 = vmatprep.subr.bf16.mxu0 %v2020_v22 }
 0x29c   :  { %1663 = vmatmul.mubr.msk.f32.vlgmr.msra.gmra.mrb[16].mxu0 %vm701_vm3, %v694_v59 }
 0x29d   :  { %1743 = vmatprep.mubr.msk.f32.mxu0 %vm2022_vm2, %v2023_v62 }
 0x36f   :  { %v819_v2 = vpop.f32.mrb[16].mxu0 }
 0x370   :  { %v820_v3 = vadd.f32 %v819_v2, %v699_v0  ;;  %v1664_v4 = vpop.f32.mrb[17].mxu0  ;;  %v1145_v2 = vld [vmem:[%s2540_s13] sm:$0xff] }
 0x372   :  { %823 = vst [vmem:[#allocation9] sm:$0x3] %v820_v3  ;;  %v832_v6 = vsel %vm831_vm5, %v820_v3, -1e+30  ;;  %v1146_v3 = vld [vmem:[%s2540_s13 + $0x8] sm:$0xff] }
 0x373   :  { %v835_v7 = vsel %vm834_vm6, %v832_v6, -inf  ;;  %v1825_v4 = vpack.c.bf16 %v1146_v3, %v1145_v2 }
 0x374   :  { %836 = vmax.xlane.f32.xlu1 %v835_v7  ;;  %v1148_v7 = vld [vmem:[%s2540_s13 + $0x18] sm:$0xff] }
 0x401   :  { %v837_v20 = vpop.xlane.xlu1 %836 }
 0x402   :  { %v838_v25 = vmax.f32 %v833_v18, %v837_v20  ;;  %v1150_v20 = vld [vmem:[%s2540_s13 + $0x28] sm:$0xff] }
 0x404   :  { %v839_v27 = vsub.f32 %v833_v18, %v838_v25  ;;  %938 = vst.msk [vmem:[#allocation2] sm:$0x3] %vm71_vm7, %v838_v25  ;;  %844 = vperm.xlu0 %1850, %v838_v25   ;;  %v1149_v18 = vld [vmem:[%s2540_s13 + $0x20] sm:$0xff] }
 0x405   :  { %v1831_v25 = vpack.c.bf16 %v1150_v20, %v1149_v18 }
 0x406   :  { %v840_v31 = vmul.f32 1.442695, %v839_v27  ;;  %v1234_v27 = vld [vmem:[%s2542_s15] sm:$0xff] }
 0x408   :  { %1958 = vpow2.f32 %v840_v31  ;;  %v1235_v31 = vld [vmem:[%s2542_s15 + $0x8] sm:$0xff] }
 0x412   :  { %v1959_v33 = vpop.eup %1958 }
 0x413   :  { %861 = vperm.xlu1 %1851, %v1959_v33   ;;  %v851_v30 = vmul.f32 %v1959_v33, %v850_v29  ;;  %v1151_v33 = vld [vmem:[%s2540_s13 + $0x30] sm:$0xff] }
 0x483   :  { %v845_v9 = vpop.permute.xlu0 %844 }
 0x484   :  { %v847_v10 = vsub.f32 %v832_v6, %v845_v9  ;;  %v1147_v6 = vld [vmem:[%s2540_s13 + $0x10] sm:$0xff]  ;;  %v1152_v9 = vld [vmem:[%s2540_s13 + $0x38] sm:$0xff] }
 0x485   :  { %v1828_v8 = vpack.c.bf16 %v1148_v7, %v1147_v6 }
 0x486   :  { %v848_v11 = vmul.f32 1.442695, %v847_v10  ;;  %v1837_v10 = vpack.c.bf16 %v1235_v31, %v1234_v27 }
 0x488   :  { %1960 = vpow2.f32 %v848_v11  ;;  %1838 = vmatpush3.bf16.msra.mxu0 %v1837_v10  ;;  %v1834_v11 = vpack.c.bf16 %v1152_v9, %v1151_v33 }
 0x489   :  { %1839 = vmatprep.subr.bf16.mxu0 %v2020_v22 }
 0x492   :  { %v1961_v39 = vpop.eup %1960  ;;  %v862_v36 = vpop.permute.xlu1 %861 }
 0x493   :  { %1698 = vmatmul.mubr.f32.vlgmr.msra.gmra.mrb[16].mxu1 %v1961_v39  ;;  %v852_v13 = vsel %vm834_vm6, %v1961_v39, 0.0  ;;  %v864_v38 = vmul.f32 %v862_v36, %v858_v35 }
 0x494   :  { %1701 = vmatpush3.msk.msra.mxu1 %vm972_vm9, %v966_v37  ;;  %853 = vadd.xlane.f32.xlu0 %v852_v13 }
 0x495   :  { %1702 = vmatprep.mubr.msk.f32.mxu1 %vm2022_vm2, %v2023_v62  ;;  %1818 = vmatprep.subr.bf16.mxu1 %v2020_v22 }
 0x497   :  { %1703 = vmatmul.mubr.msk.f32.vlgmr.msra.gmra.mrb[18].mxu1 %vm968_vm10, %v965_v14 }
 0x498   :  { %1713 = vmatprep.mubr.msk.f32.mxu1 %vm2022_vm2, %v2023_v62  ;;  %1820 = vmatpush3.bf16.msra.mxu1 %v1819_v21  ;;  %v1141_v21 = vshrl.u32 %v824_v60, 7  ;;  %v1477_v60 = vld [vmem:[%s2541_s14] ss:$0 sm:$0xff] }
 0x499   :  { %1821 = vmatprep.subr.bf16.mxu1 %v2020_v22 }
 0x49a   :  { %v1142_v24 = vsub.s32 0, %v1141_v21 }
 0x49c   :  { %1823 = vmatpush3.bf16.msra.mxu1 %v1822_v26 }
 0x49d   :  { %1824 = vmatprep.subr.bf16.mxu1 %v2020_v22 }
 0x521   :  { %v854_v32 = vpop.xlane.xlu0 %853 }
 0x522   :  { %v855_v46 = vadd.f32 %v854_v32, %v851_v30 }
 0x524   :  { %857 = vst.msk [vmem:[#allocation3] sm:$0x3] %vm71_vm7, %v855_v46 }
 0x52b   :  { %v943_v52 = vld [vmem:[#allocation3] sm:$0x3] }
 0x52c   :  { %1962 = vrcp.f32 %v943_v52  ;;  %v1237_v52 = vld [vmem:[%s2542_s15 + $0x18] sm:$0xff] }
 0x536   :  { %v1963_v34 = vpop.eup %1962 }
 0x537   :  { %947 = vperm.xlu0 %1850, %v1963_v34  }
 0x566   :  { %v931_v58 = vpop.f32.mrb[16].mxu1 }
 0x567   :  { %v935_v40 = vadd.f32 %v931_v58, %v864_v38  ;;  %v1699_v16 = vpop.f32.mrb[17].mxu1 }
 0x569   :  { %937 = vst.msk [vmem:[#allocation4] sm:$0x3] %vm74_vm8, %v935_v40  ;;  %v1479_v40 = vld [vmem:[%s2543_s16] ss:$0 sm:$0xff] }
 0x56a   :  { %v1042_v1 = vpop.f32.mrb[18].mxu1 }
 0x56b   :  { %v1043_v42 = vadd.f32 %v1042_v1, %v967_v41  ;;  %v1704_v43 = vpop.f32.mrb[19].mxu1 }
 0x56d   :  { %v1046_v5 = vmax.f32 %v1043_v42, 0.0  ;;  %v1319_v42 = vld [vmem:[%s2544_s17] sm:$0x3]  ;;  %s2026_s17 = smov [#allocation9]  }
 0x56f   :  { %1714 = vmatmul.mubr.msk.f32.vlgmr.msra.gmra.mrb[20].mxu1 %vm155_vm0, %v1046_v5 }
 0x570   :  { %1732 = vmatprep.mubr.msk.f32.mxu1 %vm2022_vm2, %v2023_v62  ;;  %v942_v44 = vld [vmem:[#allocation4] sm:$0x3]  ;;  %1826 = vmatpush3.bf16.msra.mxu1 %v1825_v4 }
 0x571   :  { %1827 = vmatprep.subr.bf16.mxu1 %v2020_v22 }
 0x574   :  { %1829 = vmatpush3.bf16.msra.mxu1 %v1828_v8 }
 0x575   :  { %1830 = vmatprep.subr.bf16.mxu1 %v2020_v22 }
 0x578   :  { %1832 = vmatpush3.bf16.msra.mxu1 %v1831_v25 }
 0x579   :  { %1833 = vmatprep.subr.bf16.mxu1 %v2020_v22  ;;  %v1236_v22 = vld [vmem:[%s2542_s15 + $0x10] sm:$0xff] }
 0x57a   :  { %v1840_v34 = vpack.c.bf16 %v1237_v52, %v1236_v22 }
 0x57c   :  { %1835 = vmatpush3.bf16.msra.mxu1 %v1834_v11  ;;  %1841 = vmatpush3.bf16.msra.mxu0 %v1840_v34 }
 0x5b6   :  { %v948_v45 = vpop.permute.xlu0 %947 }
 0x5b7   :  { %v950_v12 = vmul.f32 %v948_v45, %v942_v44 }
 0x5b9   :  { %v951_v47 = vsel %vm74_vm8, %v950_v12, 0.0 }
 0x5ba   :  { %952 = vadd.xlane.f32.xlu0 %v951_v47 }
 0x642   :  { %v1121_v49 = vpop.f32.mrb[20].mxu1 }
 0x643   :  { %v1122_v50 = vadd.f32 %v1121_v49, %v1051_v48  ;;  %v1715_v51 = vpop.f32.mrb[21].mxu1 }
 0x645   :  { %v1125_v19 = vmax.f32 %v1122_v50, 0.0 }
 0x647   :  { %v1127_v53 = vsel %vm1126_vm11, %v1125_v19, 0.0  ;;  %v953_v54 = vpop.xlane.xlu0 %952 }
 0x648   :  { %1128 = vadd.xlane.f32.xlu1 %v1127_v53  ;;  %v955_v55 = vmul.f32 0.015625, %v953_v54 }
 0x64a   :  { %v956_v28 = vsub.f32 %v950_v12, %v955_v55  ;;  %v1357_v12 = vld [vmem:[%s2545_s18] sm:$0x1]  ;;  %s1391_s18 = sshll.u32 %s2026_s17, 4  ;;  %s1392_s18 = int_to_ptr.vmem [resolvable:$true] %s1391_s18 }
 0x64b   :  { %s1972_s22 = scalar_lea.vmem %s1392_s18, 32  ;;  %p1977_p1 = scmp.lt.s32.totalorder %s1392_s18, %s1392_s18 }
 0x64c   :  { %v957_v63 = vmul.f32 %v956_v28, %v956_v28  ;;  %p1973_p0 = scmp.ne.s32.totalorder %s1392_s18, %s1972_s22  ;;  %p1978_p2 = scmp.lt.s32.totalorder %s1972_s22, %s1972_s22 }
 0x64e   :  { %v958_v0 = vsel %vm74_vm8, %v957_v63, 0.0  ;;  %p1979_p3 = por %p1978_p2, %p1977_p1 }
 0x650   :  { %p1980_p4 = pnand %p1979_p3, %p1973_p0 }
 0x6d5   :  { %v1129_v62 = vpop.xlane.xlu1 %1128 }
 0x6d6   :  { %v1130_v56 = vmul.f32 0.015625, %v1129_v62 }
 0x6d8   :  { %v1131_v57 = vsub.f32 %v1125_v19, %v1130_v56 }
 0x6da   :  { %v1132_v59 = vmul.f32 %v1131_v57, %v1131_v57 }
 0x6dc   :  { %v1133_v61 = vsel %vm1126_vm11, %v1132_v59, 0.0 }
 0x6dd   :  { %1134 = vadd.xlane.f32.xlu1 %v1133_v61 }
 0x6e1   :  { %959 = vadd.xlane.f32.xlu1 %v958_v0 }
 0x76a   :  { %v1135_v37 = vpop.xlane.xlu1 %1134 }
 0x76b   :  { %v1136_v39 = vmul.f32 0.015625, %v1135_v37 }
 0x76d   :  { %v1137_v13 = vadd.f32 1e-05, %v1136_v39 }
 0x76e   :  { %v960_v14 = vpop.xlane.xlu1 %959 }
 0x76f   :  { %1964 = vrsqrt.f32 %v1137_v13  ;;  %v961_v15 = vmul.f32 0.015625, %v960_v14 }
 0x771   :  { %v962_v17 = vadd.f32 1e-05, %v961_v15 }
 0x773   :  { %1966 = vrsqrt.f32 %v962_v17 }
 0x779   :  { %v1965_v23 = vpop.eup %1964 }
 0x77a   :  { %v1139_v26 = vmul.f32 %v1965_v23, %v1131_v57 }
 0x77c   :  { %v1143_v32 = vrot.slane %v1139_v26, %v1142_v24 }
 0x77d   :  { %v1967_v29 = vpop.eup %1966 }
 0x77e   :  { %v964_v30 = vmul.f32 %v1967_v29, %v956_v28 }
 0x780   :  { %v1144_v46 = vmax.f32 %v964_v30, %v1143_v32 }
 0x782   :  { %1733 = vmatmul.mubr.msk.f32.vlgmr.msra.gmra.mrb[22].mxu1 %vm308_vm1, %v1144_v46 }
 0x855   :  { %v1229_v35 = vpop.f32.mrb[22].mxu1 }
 0x856   :  { %v1230_v36 = vadd.f32 %v1477_v60, %v1229_v35  ;;  %v1734_v38 = vpop.f32.mrb[23].mxu1 }
 0x858   :  { %v1233_v58 = vmax.f32 %v1230_v36, 0.0 }
 0x85a   :  { %1744 = vmatmul.mubr.msk.f32.vlgmr.msra.gmra.mrb[18].mxu0 %vm155_vm0, %v1233_v58 }
 0x92d   :  { %v1314_v16 = vpop.f32.mrb[18].mxu0 }
 0x92e   :  { %v1315_v41 = vadd.f32 %v1479_v40, %v1314_v16  ;;  %v1745_v1 = vpop.f32.mrb[19].mxu0 }
 0x930   :  { %v1318_v43 = vmax.f32 %v1315_v41, 0.0 }
 0x932   :  { %v1320_v5 = vmul.f32 %v1319_v42, %v1318_v43 }
 0x934   :  { %v1322_v44 = vsel %vm1321_vm12, %v1320_v5, 0.0 }
 0x935   :  { %1323 = vadd.xlane.f32.xlu0 %v1322_v44 }
 0x9c2   :  { %v1324_v45 = vpop.xlane.xlu0 %1323 }
 0x9c3   :  { %1325 = vxpose.xlu1.b32.start.end [1/1] (short) (narrow) %v1324_v45, 8 }
 0xa43   :  { %v1341_v47 = vpop.trf.xlu1 }
 0xa44   :  { %v1358_v48 = vadd.f32 %v1357_v12, %v1341_v47 }
 0xa46   :  { %v1361_v49 = vsel %vm1359_vm13, %v1358_v48, -inf  ;;  %1360 = vst.msk [vmem:[%s2546_s19] sm:$0x1] %vm1359_vm13, %v1358_v48 }
 0xa47   :  { %1362 = vmax.xlane.f32.xlu0 %v1361_v49 }
 0xad4   :  { %v1363_v50 = vpop.xlane.xlu0 %1362 }
 0xad5   :  { %v1364_v51 = vsub.f32 %v1358_v48, %v1363_v50 }
 0xad7   :  { %v1365_v19 = vmul.f32 1.442695, %v1364_v51 }
 0xad9   :  { %1968 = vpow2.f32 %v1365_v19 }
 0xae3   :  { %v1969_v53 = vpop.eup %1968 }
 0xae4   :  { %v1367_v54 = vsel %vm1359_vm13, %v1969_v53, 0.0 }
 0xae5   :  { %1368 = vadd.xlane.f32.xlu0 %v1367_v54 }
 0xae6   :  { %1983 = shalt.err (!%p1980_p4)
}
 0xae7   :  { %s1984_s9 = scalar_lea.hbm %s2548_s21, 32 }
 0xae8   :  { %p1985_p5 = scmp.ne.s32.totalorder %s2548_s21, %s1984_s9  ;;  %p1988_p6 = scmp.lt.u32.totalorder %s1984_s9, %s2548_s21 }
 0xaea   :  { %p1990_p7 = pnand %p1988_p6, %p1985_p5 }
 0xaec   :  { %1993 = shalt.err (!%p1990_p7)
}
 0xaed   :  { %1394 = dma.vmem_to_hbm [thread:$0]  %s1392_s18, 32, %s2548_s21, [#allocation10]  }
 0xaee   :  { %s2027_s26 = smov [#allocation7]  }
 0xaef   :  { %s1381_s11 = sshll.u32 %s2027_s26, 4  ;;  %s1382_s11 = int_to_ptr.vmem [resolvable:$true] %s1381_s11 }
 0xaf0   :  { %s1994_s27 = scalar_lea.vmem %s1382_s11, 16  ;;  %s1998_s13 = scalar_lea.vmem %s1382_s11, 32 }
 0xaf1   :  { %p1995_p8 = scmp.ne.s32.totalorder %s1382_s11, %s1994_s27  ;;  %p1999_p9 = scmp.lt.s32.totalorder %s1382_s11, %s1382_s11 }
 0xaf2   :  { %p2000_p10 = scmp.lt.s32.totalorder %s1998_s13, %s1994_s27 }
 0xaf4   :  { %p2001_p11 = por %p2000_p10, %p1999_p9 }
 0xaf6   :  { %p2002_p12 = pnand %p2001_p11, %p1995_p8 }
 0xb72   :  { %v1369_v55 = vpop.xlane.xlu0 %1368 }
 0xb73   :  { %1970 = vrcp.f32 %v1369_v55 }
 0xb7d   :  { %v1971_v62 = vpop.eup %1970 }
 0xb7e   :  { %v1371_v56 = vmul.f32 %v1971_v62, %v1969_v53 }
 0xb80   :  { %1372 = vst.msk [vmem:[#allocation7] sm:$0x1] %vm1359_vm13, %v1371_v56 }
 0xb81   :  { %2005 = shalt.err (!%p2002_p12)
}
 0xb82   :  { %s2006_s21 = scalar_lea.hbm %s2547_s20, 16 }
 0xb83   :  { %p2007_p13 = scmp.ne.s32.totalorder %s2547_s20, %s2006_s21  ;;  %p2010_p0 = scmp.lt.u32.totalorder %s2006_s21, %s2547_s20 }
 0xb85   :  { %p2012_p1 = pnand %p2010_p0, %p2007_p13 }
 0xb87   :  { %2015 = shalt.err (!%p2012_p1)
}
 0xb88   :  { %1384 = dma.vmem_to_hbm [thread:$0]  %s1382_s11, 16, %s2547_s20, [#allocation8]  }
 0xb89   :  { %2016 = dma.done.wait [#allocation8], 16  }
 0xb8a   :  { %2017 = vsyncadd [#allocation8], 4294967280 }
 0xb8b   :  { %2018 = dma.done.wait [#allocation10], 32  }
 0xb8c   :  { %2019 = vsyncadd [#allocation10], 4294967264 }
 0xb8d   :  { %1403 = vsyncpa [#allocation8], 1 }
 0xb8e   :  { %1404 = vsyncpa [#allocation10], 1 }

</bundles_post_ra>
